<compile_context>
chip_gen: v6e
topology: v6e:2x2x1
jax: 0.10.0
libtpu: 0.0.40
codegen_flags: <defaults>
</compile_context>

<pallas_src>
import math

import jax
import jax.numpy as jnp
from jax.experimental import pallas as pl
from jax.experimental.pallas import tpu as pltpu


# --------------------------------------------------------------------------
# Fused 3x3 conv (stride 1, pad 1, bias) -- one image per grid step
# --------------------------------------------------------------------------
def make_conv3x3_kernel(H, W, Cin, Cout):
    def kernel(x_ref, w_ref, b_ref, out_ref, pad_ref):
        # x_ref  : (1, H, W, Cin)     channels-last image block
        # w_ref  : (9, Cin, Cout)     conv taps, row-major over (dy, dx)
        # b_ref  : (1, Cout)
        # out_ref: (1, H*W, Cout)
        # pad_ref: (H+2, W+2, Cin)    zero-padded input plane (VMEM scratch)

        # ---- zero only the 1-pixel border (interior overwritten below) ----
        pad_ref[0:1, :, :] = jnp.zeros((1, W + 2, Cin), jnp.float32)
        pad_ref[H + 1:H + 2, :, :] = jnp.zeros((1, W + 2, Cin), jnp.float32)
        pad_ref[:, 0:1, :] = jnp.zeros((H + 2, 1, Cin), jnp.float32)
        pad_ref[:, W + 1:W + 2, :] = jnp.zeros((H + 2, 1, Cin), jnp.float32)

        # ---- single bulk interior store (no per-row scatter loop) ----
        pad_ref[1:H + 1, 1:W + 1, :] = x_ref[0]

        # ---- 3x3 conv = 9 shifted-window channel matmuls (MXU), f32 acc ----
        acc = jnp.zeros((H * W, Cout), jnp.float32) + b_ref[...]
        for dy in range(3):
            for dx in range(3):
                slab = pad_ref[dy:dy + H, dx:dx + W, :]        # (H, W, Cin)
                xs = slab.reshape(H * W, Cin)                  # lane-preserving
                acc = acc + jnp.dot(xs, w_ref[3 * dy + dx],
                                    preferred_element_type=jnp.float32)

        out_ref[0] = acc

    return kernel


@jax.jit
def output_proj_forward(x_blc, w_taps, bias):
    """x_blc: (B, L, Cin) -> (B, Cout, H, W), H = W = sqrt(L)."""
    B, L, Cin = x_blc.shape
    H = W = int(math.isqrt(L))
    assert H * W == L, "L must be a perfect square"
    Cout = w_taps.shape[-1]

    # (B, L, Cin) is already channels-last row-major; this reshape is free.
    x4 = x_blc.reshape(B, H, W, Cin)

    y = pl.pallas_call(
        make_conv3x3_kernel(H, W, Cin, Cout),
        out_shape=jax.ShapeDtypeStruct((B, H * W, Cout), jnp.float32),
        grid_spec=pltpu.PrefetchScalarGridSpec(
            num_scalar_prefetch=0,
            grid=(B,),
            in_specs=[
                pl.BlockSpec((1, H, W, Cin), lambda b: (b, 0, 0, 0)),
                pl.BlockSpec((9, Cin, Cout), lambda b: (0, 0, 0)),
                pl.BlockSpec((1, Cout), lambda b: (0, 0)),
            ],
            out_specs=pl.BlockSpec((1, H * W, Cout), lambda b: (b, 0, 0)),
            scratch_shapes=[pltpu.VMEM((H + 2, W + 2, Cin), jnp.float32)],
        ),
        compiler_params=pltpu.CompilerParams(
            dimension_semantics=("parallel",)),
    )(x4, w_taps, bias)

    # Layout plumbing only: (B, L, Cout) -> NCHW (B, Cout, H, W), matching the
    # PyTorch module's return layout (Cout=3, a few KiB -- negligible).
    return jnp.transpose(y, (0, 2, 1)).reshape(B, Cout, H, W)


# --------------------------------------------------------------------------
# Weight-layout conversion + pure-JAX reference (mirrors torch Conv2d)
# --------------------------------------------------------------------------
def taps_from_oihw(w_oihw):
    """Torch-layout conv weight (Cout, Cin, 3, 3) -> (9, Cin, Cout) taps."""
    Cout, Cin, kh, kw = w_oihw.shape
    return jnp.transpose(w_oihw, (2, 3, 1, 0)).reshape(kh * kw, Cin, Cout)


def reference_forward(x_blc, w_oihw, b):
    B, L, C = x_blc.shape
    H = W = int(math.isqrt(L))
    x_nchw = jnp.transpose(x_blc, (0, 2, 1)).reshape(B, C, H, W)
    y = jax.lax.conv_general_dilated(
        x_nchw, w_oihw, window_strides=(1, 1), padding=((1, 1), (1, 1)),
        dimension_numbers=("NCHW", "OIHW", "NCHW"),
        precision=jax.lax.Precision.HIGHEST)
    return y + b.reshape(1, -1, 1, 1)


# --------------------------------------------------------------------------
# Demo
# --------------------------------------------------------------------------
if __name__ == "__main__":
    B, IN_C, OUT_C, H, W = 2, 64, 3, 16, 16       # module defaults: 64 -> 3
    L = H * W

    key = jax.random.PRNGKey(0)
    kx, kw, kb = jax.random.split(key, 3)
    x = jax.random.normal(kx, (B, L, IN_C), jnp.float32)
    w_oihw = (jax.random.normal(kw, (OUT_C, IN_C, 3, 3)) * 0.1).astype(jnp.float32)
    b = (jax.random.normal(kb, (OUT_C,)) * 0.02).astype(jnp.float32)

    w_taps = taps_from_oihw(w_oihw)
    bias = b.reshape(1, OUT_C)

    out = output_proj_forward(x, w_taps, bias)
    out = jax.block_until_ready(out)
    assert out.shape == (B, OUT_C, H, W), out.shape

    ref = reference_forward(x, w_oihw, b)
    max_err = float(jnp.max(jnp.abs(out - ref)))
    # f32-accumulated MXU matmuls vs XLA's conv may differ at bf16-pass level.
    assert max_err < 1e-2, f"mismatch vs reference: {max_err}"

    print("KERNEL_OK")
</pallas_src>

<mosaic_0001>
module attributes {stable_mosaic.version = 11 : i64} {
  func.func @kernel(%arg0: i32, %arg1: memref<1x16x16x64xf32, #tpu.memory_space<vmem>>, %arg2: memref<9x64x3xf32, #tpu.memory_space<vmem>>, %arg3: memref<1x3xf32, #tpu.memory_space<vmem>>, %arg4: memref<1x256x3xf32, #tpu.memory_space<vmem>>, %arg5: memref<18x18x64xf32, #tpu.memory_space<vmem>>) attributes {dimension_semantics = [#tpu.dimension_semantics<parallel>], iteration_bounds = array<i64: 2>, scalar_prefetch = 0 : i64, scratch_operands = 1 : i64, tpu.core_type = #tpu.core_type<tc>, window_params = [{transform_indices = @transform_0, window_bounds = array<i64: 1, 16, 16, 64>}, {pipeline_mode = #tpu.pipeline_mode<synchronous>, transform_indices = @transform_1, window_bounds = array<i64: 9, 64, 3>}, {pipeline_mode = #tpu.pipeline_mode<synchronous>, transform_indices = @transform_2, window_bounds = array<i64: 1, 3>}, {transform_indices = @transform_3, window_bounds = array<i64: 1, 256, 3>}]} {
    %cst = arith.constant 0.000000e+00 : f32
    %0 = vector.broadcast %cst : f32 to vector<1x18x64xf32>
    %c0 = arith.constant 0 : index
    %c0_0 = arith.constant 0 : index
    %c0_1 = arith.constant 0 : index
    %1 = vector.load %arg5[%c0, %c0_0, %c0_1] : memref<18x18x64xf32, #tpu.memory_space<vmem>>, vector<1x18x64xf32>
    tpu.vector_store %arg5[%c0, %c0_0, %c0_1], %0 {strides = array<i32>} : memref<18x18x64xf32, #tpu.memory_space<vmem>>, vector<1x18x64xf32>,
    %cst_2 = arith.constant 0.000000e+00 : f32
    %2 = vector.broadcast %cst_2 : f32 to vector<1x18x64xf32>
    %c17 = arith.constant 17 : index
    %c0_3 = arith.constant 0 : index
    %c0_4 = arith.constant 0 : index
    %3 = vector.load %arg5[%c17, %c0_3, %c0_4] : memref<18x18x64xf32, #tpu.memory_space<vmem>>, vector<1x18x64xf32>
    tpu.vector_store %arg5[%c17, %c0_3, %c0_4], %2 {strides = array<i32>} : memref<18x18x64xf32, #tpu.memory_space<vmem>>, vector<1x18x64xf32>,
    %cst_5 = arith.constant 0.000000e+00 : f32
    %4 = vector.broadcast %cst_5 : f32 to vector<18x1x64xf32>
    %c0_6 = arith.constant 0 : index
    %c0_7 = arith.constant 0 : index
    %c0_8 = arith.constant 0 : index
    %5 = vector.load %arg5[%c0_6, %c0_7, %c0_8] : memref<18x18x64xf32, #tpu.memory_space<vmem>>, vector<18x1x64xf32>
    tpu.vector_store %arg5[%c0_6, %c0_7, %c0_8], %4 {strides = array<i32>} : memref<18x18x64xf32, #tpu.memory_space<vmem>>, vector<18x1x64xf32>,
    %cst_9 = arith.constant 0.000000e+00 : f32
    %6 = vector.broadcast %cst_9 : f32 to vector<18x1x64xf32>
    %c0_10 = arith.constant 0 : index
    %c17_11 = arith.constant 17 : index
    %c0_12 = arith.constant 0 : index
    %7 = vector.load %arg5[%c0_10, %c17_11, %c0_12] : memref<18x18x64xf32, #tpu.memory_space<vmem>>, vector<18x1x64xf32>
    tpu.vector_store %arg5[%c0_10, %c17_11, %c0_12], %6 {strides = array<i32>} : memref<18x18x64xf32, #tpu.memory_space<vmem>>, vector<18x1x64xf32>,
    %c0_13 = arith.constant 0 : index
    %c0_14 = arith.constant 0 : index
    %c0_15 = arith.constant 0 : index
    %c0_16 = arith.constant 0 : index
    %8 = vector.load %arg1[%c0_13, %c0_14, %c0_15, %c0_16] : memref<1x16x16x64xf32, #tpu.memory_space<vmem>>, vector<1x16x16x64xf32>
    %9 = vector.shape_cast %8 : vector<1x16x16x64xf32> to vector<16x16x64xf32>
    %c1 = arith.constant 1 : index
    %c1_17 = arith.constant 1 : index
    %c0_18 = arith.constant 0 : index
    %10 = vector.load %arg5[%c1, %c1_17, %c0_18] : memref<18x18x64xf32, #tpu.memory_space<vmem>>, vector<16x16x64xf32>
    tpu.vector_store %arg5[%c1, %c1_17, %c0_18], %9 {strides = array<i32>} : memref<18x18x64xf32, #tpu.memory_space<vmem>>, vector<16x16x64xf32>,
    %cst_19 = arith.constant 0.000000e+00 : f32
    %11 = vector.broadcast %cst_19 : f32 to vector<256x3xf32>
    %c0_20 = arith.constant 0 : index
    %c0_21 = arith.constant 0 : index
    %12 = vector.load %arg3[%c0_20, %c0_21] : memref<1x3xf32, #tpu.memory_space<vmem>>, vector<1x3xf32>
    %13 = vector.broadcast %12 : vector<1x3xf32> to vector<256x3xf32>
    %14 = arith.addf %11, %13 : vector<256x3xf32>
    %c0_22 = arith.constant 0 : index
    %c0_23 = arith.constant 0 : index
    %c0_24 = arith.constant 0 : index
    %15 = vector.load %arg5[%c0_22, %c0_23, %c0_24] : memref<18x18x64xf32, #tpu.memory_space<vmem>>, vector<16x16x64xf32>
    %16 = vector.shape_cast %15 : vector<16x16x64xf32> to vector<256x64xf32>
    %c0_25 = arith.constant 0 : index
    %c0_26 = arith.constant 0 : index
    %c0_27 = arith.constant 0 : index
    %17 = vector.load %arg2[%c0_25, %c0_26, %c0_27] : memref<9x64x3xf32, #tpu.memory_space<vmem>>, vector<1x64x3xf32>
    %18 = vector.shape_cast %17 : vector<1x64x3xf32> to vector<64x3xf32>
    %cst_28 = arith.constant dense<0.000000e+00> : vector<256x3xf32>
    %19 = tpu.matmul %16, %18, %cst_28 {dimension_numbers = #tpu.dot_dimension_numbers<[1], [0], [0], [1], [0, 0, 1, 1], [], []>} : vector<256x64xf32>, vector<64x3xf32>, vector<256x3xf32> -> vector<256x3xf32>
    %20 = arith.addf %14, %19 : vector<256x3xf32>
    %c0_29 = arith.constant 0 : index
    %c1_30 = arith.constant 1 : index
    %c0_31 = arith.constant 0 : index
    %21 = vector.load %arg5[%c0_29, %c1_30, %c0_31] : memref<18x18x64xf32, #tpu.memory_space<vmem>>, vector<16x16x64xf32>
    %22 = vector.shape_cast %21 : vector<16x16x64xf32> to vector<256x64xf32>
    %c1_32 = arith.constant 1 : index
    %c0_33 = arith.constant 0 : index
    %c0_34 = arith.constant 0 : index
    %23 = vector.load %arg2[%c1_32, %c0_33, %c0_34] : memref<9x64x3xf32, #tpu.memory_space<vmem>>, vector<1x64x3xf32>
    %24 = vector.shape_cast %23 : vector<1x64x3xf32> to vector<64x3xf32>
    %cst_35 = arith.constant dense<0.000000e+00> : vector<256x3xf32>
    %25 = tpu.matmul %22, %24, %cst_35 {dimension_numbers = #tpu.dot_dimension_numbers<[1], [0], [0], [1], [0, 0, 1, 1], [], []>} : vector<256x64xf32>, vector<64x3xf32>, vector<256x3xf32> -> vector<256x3xf32>
    %26 = arith.addf %20, %25 : vector<256x3xf32>
    %c0_36 = arith.constant 0 : index
    %c2 = arith.constant 2 : index
    %c0_37 = arith.constant 0 : index
    %27 = vector.load %arg5[%c0_36, %c2, %c0_37] : memref<18x18x64xf32, #tpu.memory_space<vmem>>, vector<16x16x64xf32>
    %28 = vector.shape_cast %27 : vector<16x16x64xf32> to vector<256x64xf32>
    %c2_38 = arith.constant 2 : index
    %c0_39 = arith.constant 0 : index
    %c0_40 = arith.constant 0 : index
    %29 = vector.load %arg2[%c2_38, %c0_39, %c0_40] : memref<9x64x3xf32, #tpu.memory_space<vmem>>, vector<1x64x3xf32>
    %30 = vector.shape_cast %29 : vector<1x64x3xf32> to vector<64x3xf32>
    %cst_41 = arith.constant dense<0.000000e+00> : vector<256x3xf32>
    %31 = tpu.matmul %28, %30, %cst_41 {dimension_numbers = #tpu.dot_dimension_numbers<[1], [0], [0], [1], [0, 0, 1, 1], [], []>} : vector<256x64xf32>, vector<64x3xf32>, vector<256x3xf32> -> vector<256x3xf32>
    %32 = arith.addf %26, %31 : vector<256x3xf32>
    %c1_42 = arith.constant 1 : index
    %c0_43 = arith.constant 0 : index
    %c0_44 = arith.constant 0 : index
    %33 = vector.load %arg5[%c1_42, %c0_43, %c0_44] : memref<18x18x64xf32, #tpu.memory_space<vmem>>, vector<16x16x64xf32>
    %34 = vector.shape_cast %33 : vector<16x16x64xf32> to vector<256x64xf32>
    %c3 = arith.constant 3 : index
    %c0_45 = arith.constant 0 : index
    %c0_46 = arith.constant 0 : index
    %35 = vector.load %arg2[%c3, %c0_45, %c0_46] : memref<9x64x3xf32, #tpu.memory_space<vmem>>, vector<1x64x3xf32>
    %36 = vector.shape_cast %35 : vector<1x64x3xf32> to vector<64x3xf32>
    %cst_47 = arith.constant dense<0.000000e+00> : vector<256x3xf32>
    %37 = tpu.matmul %34, %36, %cst_47 {dimension_numbers = #tpu.dot_dimension_numbers<[1], [0], [0], [1], [0, 0, 1, 1], [], []>} : vector<256x64xf32>, vector<64x3xf32>, vector<256x3xf32> -> vector<256x3xf32>
    %38 = arith.addf %32, %37 : vector<256x3xf32>
    %c1_48 = arith.constant 1 : index
    %c1_49 = arith.constant 1 : index
    %c0_50 = arith.constant 0 : index
    %39 = vector.load %arg5[%c1_48, %c1_49, %c0_50] : memref<18x18x64xf32, #tpu.memory_space<vmem>>, vector<16x16x64xf32>
    %40 = vector.shape_cast %39 : vector<16x16x64xf32> to vector<256x64xf32>
    %c4 = arith.constant 4 : index
    %c0_51 = arith.constant 0 : index
    %c0_52 = arith.constant 0 : index
    %41 = vector.load %arg2[%c4, %c0_51, %c0_52] : memref<9x64x3xf32, #tpu.memory_space<vmem>>, vector<1x64x3xf32>
    %42 = vector.shape_cast %41 : vector<1x64x3xf32> to vector<64x3xf32>
    %cst_53 = arith.constant dense<0.000000e+00> : vector<256x3xf32>
    %43 = tpu.matmul %40, %42, %cst_53 {dimension_numbers = #tpu.dot_dimension_numbers<[1], [0], [0], [1], [0, 0, 1, 1], [], []>} : vector<256x64xf32>, vector<64x3xf32>, vector<256x3xf32> -> vector<256x3xf32>
    %44 = arith.addf %38, %43 : vector<256x3xf32>
    %c1_54 = arith.constant 1 : index
    %c2_55 = arith.constant 2 : index
    %c0_56 = arith.constant 0 : index
    %45 = vector.load %arg5[%c1_54, %c2_55, %c0_56] : memref<18x18x64xf32, #tpu.memory_space<vmem>>, vector<16x16x64xf32>
    %46 = vector.shape_cast %45 : vector<16x16x64xf32> to vector<256x64xf32>
    %c5 = arith.constant 5 : index
    %c0_57 = arith.constant 0 : index
    %c0_58 = arith.constant 0 : index
    %47 = vector.load %arg2[%c5, %c0_57, %c0_58] : memref<9x64x3xf32, #tpu.memory_space<vmem>>, vector<1x64x3xf32>
    %48 = vector.shape_cast %47 : vector<1x64x3xf32> to vector<64x3xf32>
    %cst_59 = arith.constant dense<0.000000e+00> : vector<256x3xf32>
    %49 = tpu.matmul %46, %48, %cst_59 {dimension_numbers = #tpu.dot_dimension_numbers<[1], [0], [0], [1], [0, 0, 1, 1], [], []>} : vector<256x64xf32>, vector<64x3xf32>, vector<256x3xf32> -> vector<256x3xf32>
    %50 = arith.addf %44, %49 : vector<256x3xf32>
    %c2_60 = arith.constant 2 : index
    %c0_61 = arith.constant 0 : index
    %c0_62 = arith.constant 0 : index
    %51 = vector.load %arg5[%c2_60, %c0_61, %c0_62] : memref<18x18x64xf32, #tpu.memory_space<vmem>>, vector<16x16x64xf32>
    %52 = vector.shape_cast %51 : vector<16x16x64xf32> to vector<256x64xf32>
    %c6 = arith.constant 6 : index
    %c0_63 = arith.constant 0 : index
    %c0_64 = arith.constant 0 : index
    %53 = vector.load %arg2[%c6, %c0_63, %c0_64] : memref<9x64x3xf32, #tpu.memory_space<vmem>>, vector<1x64x3xf32>
    %54 = vector.shape_cast %53 : vector<1x64x3xf32> to vector<64x3xf32>
    %cst_65 = arith.constant dense<0.000000e+00> : vector<256x3xf32>
    %55 = tpu.matmul %52, %54, %cst_65 {dimension_numbers = #tpu.dot_dimension_numbers<[1], [0], [0], [1], [0, 0, 1, 1], [], []>} : vector<256x64xf32>, vector<64x3xf32>, vector<256x3xf32> -> vector<256x3xf32>
    %56 = arith.addf %50, %55 : vector<256x3xf32>
    %c2_66 = arith.constant 2 : index
    %c1_67 = arith.constant 1 : index
    %c0_68 = arith.constant 0 : index
    %57 = vector.load %arg5[%c2_66, %c1_67, %c0_68] : memref<18x18x64xf32, #tpu.memory_space<vmem>>, vector<16x16x64xf32>
    %58 = vector.shape_cast %57 : vector<16x16x64xf32> to vector<256x64xf32>
    %c7 = arith.constant 7 : index
    %c0_69 = arith.constant 0 : index
    %c0_70 = arith.constant 0 : index
    %59 = vector.load %arg2[%c7, %c0_69, %c0_70] : memref<9x64x3xf32, #tpu.memory_space<vmem>>, vector<1x64x3xf32>
    %60 = vector.shape_cast %59 : vector<1x64x3xf32> to vector<64x3xf32>
    %cst_71 = arith.constant dense<0.000000e+00> : vector<256x3xf32>
    %61 = tpu.matmul %58, %60, %cst_71 {dimension_numbers = #tpu.dot_dimension_numbers<[1], [0], [0], [1], [0, 0, 1, 1], [], []>} : vector<256x64xf32>, vector<64x3xf32>, vector<256x3xf32> -> vector<256x3xf32>
    %62 = arith.addf %56, %61 : vector<256x3xf32>
    %c2_72 = arith.constant 2 : index
    %c2_73 = arith.constant 2 : index
    %c0_74 = arith.constant 0 : index
    %63 = vector.load %arg5[%c2_72, %c2_73, %c0_74] : memref<18x18x64xf32, #tpu.memory_space<vmem>>, vector<16x16x64xf32>
    %64 = vector.shape_cast %63 : vector<16x16x64xf32> to vector<256x64xf32>
    %c8 = arith.constant 8 : index
    %c0_75 = arith.constant 0 : index
    %c0_76 = arith.constant 0 : index
    %65 = vector.load %arg2[%c8, %c0_75, %c0_76] : memref<9x64x3xf32, #tpu.memory_space<vmem>>, vector<1x64x3xf32>
    %66 = vector.shape_cast %65 : vector<1x64x3xf32> to vector<64x3xf32>
    %cst_77 = arith.constant dense<0.000000e+00> : vector<256x3xf32>
    %67 = tpu.matmul %64, %66, %cst_77 {dimension_numbers = #tpu.dot_dimension_numbers<[1], [0], [0], [1], [0, 0, 1, 1], [], []>} : vector<256x64xf32>, vector<64x3xf32>, vector<256x3xf32> -> vector<256x3xf32>
    %68 = arith.addf %62, %67 : vector<256x3xf32>
    %c0_78 = arith.constant 0 : index
    %c0_79 = arith.constant 0 : index
    %c0_80 = arith.constant 0 : index
    %69 = vector.load %arg4[%c0_78, %c0_79, %c0_80] : memref<1x256x3xf32, #tpu.memory_space<vmem>>, vector<1x256x3xf32>
    %70 = vector.shape_cast %69 : vector<1x256x3xf32> to vector<256x3xf32>
    %71 = vector.shape_cast %68 : vector<256x3xf32> to vector<1x256x3xf32>
    tpu.vector_store %arg4[%c0_78, %c0_79, %c0_80], %71 {strides = array<i32>} : memref<1x256x3xf32, #tpu.memory_space<vmem>>, vector<1x256x3xf32>,
    return
  }
  func.func @transform_0(%arg0: i32) -> (i32, i32, i32, i32) {
    %c0_i32 = arith.constant 0 : i32
    %c0_i32_0 = arith.constant 0 : i32
    %c0_i32_1 = arith.constant 0 : i32
    %c0_i32_2 = arith.constant 0 : i32
    return %arg0, %c0_i32, %c0_i32_0, %c0_i32_1 : i32, i32, i32, i32
  }
  func.func @transform_1(%arg0: i32) -> (i32, i32, i32) {
    %c0_i32 = arith.constant 0 : i32
    %c0_i32_0 = arith.constant 0 : i32
    %c0_i32_1 = arith.constant 0 : i32
    %c0_i32_2 = arith.constant 0 : i32
    return %c0_i32, %c0_i32_0, %c0_i32_1 : i32, i32, i32
  }
  func.func @transform_2(%arg0: i32) -> (i32, i32) {
    %c0_i32 = arith.constant 0 : i32
    %c0_i32_0 = arith.constant 0 : i32
    %c0_i32_1 = arith.constant 0 : i32
    return %c0_i32, %c0_i32_0 : i32, i32
  }
  func.func @transform_3(%arg0: i32) -> (i32, i32, i32) {
    %c0_i32 = arith.constant 0 : i32
    %c0_i32_0 = arith.constant 0 : i32
    %c0_i32_1 = arith.constant 0 : i32
    return %arg0, %c0_i32, %c0_i32_0 : i32, i32, i32
  }
}

</mosaic_0001>

<bundles_post_ra>
// kernel: output_proj_forward.1
= control target key start
LH: loop header
LB: loop body
LE: loop exit
PB: predicated region body
PF: predicated region fallthrough
CT: control target
= control target key end

     0   :  { %s5280_s12 = smov 0   ;;  %s6900_s0 = inlined_call_operand.vmem [shape: f32[2,16,16,64], index: 0, kind: input, shape index: {}]   ;;  %s6901_s1 = inlined_call_operand.vmem [shape: f32[9,64,3], index: 1, kind: input, shape index: {}]   ;;  %s6902_s2 = inlined_call_operand.vmem [shape: f32[1,3], index: 2, kind: input, shape index: {}]   ;;  %s6903_s3 = inlined_call_operand.vmem [shape: f32[2,256,3], index: 3, kind: output, shape index: {}]  }
   0x1 LB: > { %s3924_s13 = sadd.s32 4294967295, %s5257_s12   ;;  %p3928_p0 = scmp.ge.s32.totalorder %s5257_s12, 1  ;;  %s5257_s12 = sphi %s5280_s12, %s13_s12  }
   0x2   : > { %p137_p1 = scmp.lt.s32.totalorder %s5257_s12, 3 }
   0x4   : > { %p138_p2 = pnand %p3928_p0, %p137_p1 }
   0x6   : > { %141 = sbr.rel (%p138_p2) target bundleno = 526 (0x20e), region = 32 }
   0xb   : > { %v329_v0 = vld [vmem:[%s6901_s1 + $0x38] sm:$0xff]  ;;  %v328_v1 = vld [vmem:[%s6901_s1 + $0x30] sm:$0xff]  ;;  %p5294_p3 = scmp.lt.s32.totalorder %s3924_s13, 1  ;;  %vm171_vm0 = vcmask 523264   ;;  %vm180_vm1 = vcmask 516096   ;;  %v5259_v2 = vmov 0.0  }
   0xc   : > { %5226 = vmatprep.subr.mxu1 %v329_v0  ;;  %4650 = vmatprep.subr.mxu0 %v329_v0  ;;  %172 = vst.msk [vmem:[#allocation2] sm:$0xff] %vm171_vm0, %v5259_v2  ;;  %173 = vst.msk [vmem:[#allocation2 + $0x8] sm:$0xff] %vm171_vm0, %v5259_v2  ;;  %vm174_vm2 = vcmask 517120   ;;  %v327_v3 = vld [vmem:[%s6901_s1 + $0x28] sm:$0xff]  ;;  %v326_v4 = vld [vmem:[%s6901_s1 + $0x20] sm:$0xff]  ;;  %vm3836_vm3 = vcmask 23552  }
   0xd   : > { %177 = vst.msk [vmem:[#allocation2 + $0x198] sm:$0xff] %vm171_vm0, %v5259_v2  ;;  %178 = vst.msk [vmem:[#allocation2 + $0x1a0] sm:$0xff] %vm171_vm0, %v5259_v2  ;;  %5234 = vmatpush3.msra.mxu1 %v329_v0  ;;  %4651 = vmatpush3.msra.mxu0 %v329_v0  ;;  %s7076_s13 = smov (!%p5294_p3, %s3924_s13), 1  ;;  %v325_v5 = vld [vmem:[%s6901_s1 + $0x18] sm:$0xff]  ;;  %v324_v12 = vld [vmem:[%s6901_s1 + $0x10] sm:$0xff] }
   0xe   : > { %189 = vst.msk [vmem:[#allocation2 + $0xc0] sm:$0x1] %vm180_vm1, %v5259_v2  ;;  %182 = vst.msk [vmem:[#allocation2 + $0x18] sm:$0x1] %vm180_vm1, %v5259_v2  ;;  %5227 = vmatprep.subr.mxu1 %v328_v1  ;;  %4652 = vmatprep.subr.mxu0 %v328_v1  ;;  %s4288_s23 = sshll.u32 %s7076_s13, 8  ;;  %v323_v15 = vld [vmem:[%s6901_s1 + $0x8] sm:$0xff] }
   0xf   : > { %183 = vst.msk [vmem:[#allocation2 + $0x30] sm:$0x1] %vm180_vm1, %v5259_v2  ;;  %184 = vst.msk [vmem:[#allocation2 + $0x48] sm:$0x1] %vm180_vm1, %v5259_v2  ;;  %5235 = vmatpush3.msra.mxu1 %v328_v1  ;;  %4653 = vmatpush3.msra.mxu0 %v328_v1  ;;  %s5359_s28 = scalar_lea.vmem %s6900_s0, %s4288_s23  ;;  %v322_v18 = vld [vmem:[%s6901_s1] sm:$0xff]  ;;  %v3973_v33 = vld [vmem:[%s6901_s1 + $0x78] sm:$0xff]  ;;  %s6745_s24 = scalar_lea.vmem %s6903_s3, %s4288_s23 }
  0x10   : > { %185 = vst.msk [vmem:[#allocation2 + $0x60] sm:$0x1] %vm180_vm1, %v5259_v2  ;;  %186 = vst.msk [vmem:[#allocation2 + $0x78] sm:$0x1] %vm180_vm1, %v5259_v2  ;;  %5228 = vmatprep.subr.mxu1 %v327_v3  ;;  %4654 = vmatprep.subr.mxu0 %v327_v3  ;;  %v231_v6 = vld [vmem:[%s5359_s28 + $0x70] sm:$0xff]  ;;  %v232_v7 = vld [vmem:[%s5359_s28 + $0x78] sm:$0xff] }
  0x11   : > { %187 = vst.msk [vmem:[#allocation2 + $0x90] sm:$0x1] %vm180_vm1, %v5259_v2  ;;  %188 = vst.msk [vmem:[#allocation2 + $0xa8] sm:$0x1] %vm180_vm1, %v5259_v2  ;;  %5236 = vmatpush3.msra.mxu1 %v327_v3  ;;  %4655 = vmatpush3.msra.mxu0 %v327_v3  ;;  %v233_v8 = vld [vmem:[%s5359_s28 + $0x80] sm:$0xff]  ;;  %v234_v10 = vld [vmem:[%s5359_s28 + $0x88] sm:$0xff] }
  0x12   : > { %190 = vst.msk [vmem:[#allocation2 + $0xd8] sm:$0x1] %vm180_vm1, %v5259_v2  ;;  %191 = vst.msk [vmem:[#allocation2 + $0xf0] sm:$0x1] %vm180_vm1, %v5259_v2  ;;  %5229 = vmatprep.subr.mxu1 %v326_v4  ;;  %4656 = vmatprep.subr.mxu0 %v326_v4  ;;  %v217_v9 = vld [vmem:[%s5359_s28] sm:$0xff]  ;;  %v218_v11 = vld [vmem:[%s5359_s28 + $0x8] sm:$0xff] }
  0x13   : > { %192 = vst.msk [vmem:[#allocation2 + $0x108] sm:$0x1] %vm180_vm1, %v5259_v2  ;;  %193 = vst.msk [vmem:[#allocation2 + $0x120] sm:$0x1] %vm180_vm1, %v5259_v2  ;;  %5237 = vmatpush3.msra.mxu1 %v326_v4  ;;  %4657 = vmatpush3.msra.mxu0 %v326_v4  ;;  %v235_v13 = vld [vmem:[%s5359_s28 + $0x90] sm:$0xff]  ;;  %v236_v16 = vld [vmem:[%s5359_s28 + $0x98] sm:$0xff] }
  0x14   : > { %194 = vst.msk [vmem:[#allocation2 + $0x138] sm:$0x1] %vm180_vm1, %v5259_v2  ;;  %195 = vst.msk [vmem:[#allocation2 + $0x150] sm:$0x1] %vm180_vm1, %v5259_v2  ;;  %v219_v14 = vld [vmem:[%s5359_s28 + $0x10] sm:$0xff]  ;;  %5230 = vmatprep.subr.mxu1 %v325_v5  ;;  %4658 = vmatprep.subr.mxu0 %v325_v5  ;;  %v220_v17 = vld [vmem:[%s5359_s28 + $0x18] sm:$0xff] }
  0x15   : > { %196 = vst.msk [vmem:[#allocation2 + $0x168] sm:$0x1] %vm180_vm1, %v5259_v2  ;;  %197 = vst.msk [vmem:[#allocation2 + $0x180] sm:$0x1] %vm180_vm1, %v5259_v2  ;;  %5238 = vmatpush3.msra.mxu1 %v325_v5  ;;  %4659 = vmatpush3.msra.mxu0 %v325_v5  ;;  %v237_v19 = vld [vmem:[%s5359_s28 + $0xa0] sm:$0xff]  ;;  %v238_v21 = vld [vmem:[%s5359_s28 + $0xa8] sm:$0xff] }
  0x16   : > { %200 = vst.msk [vmem:[#allocation2 + $0x29] sm:$0x1] %vm180_vm1, %v5259_v2  ;;  %201 = vst.msk [vmem:[#allocation2 + $0x41] sm:$0x1] %vm180_vm1, %v5259_v2  ;;  %v221_v20 = vld [vmem:[%s5359_s28 + $0x20] sm:$0xff]  ;;  %5231 = vmatprep.subr.mxu1 %v324_v12  ;;  %4660 = vmatprep.subr.mxu0 %v324_v12  ;;  %v222_v22 = vld [vmem:[%s5359_s28 + $0x28] sm:$0xff] }
  0x17   : > { %202 = vst.msk [vmem:[#allocation2 + $0x59] sm:$0x1] %vm180_vm1, %v5259_v2  ;;  %203 = vst.msk [vmem:[#allocation2 + $0x71] sm:$0x1] %vm180_vm1, %v5259_v2  ;;  %v239_v23 = vld [vmem:[%s5359_s28 + $0xb0] sm:$0xff]  ;;  %5239 = vmatpush3.msra.mxu1 %v324_v12  ;;  %4661 = vmatpush3.msra.mxu0 %v324_v12  ;;  %v240_v25 = vld [vmem:[%s5359_s28 + $0xb8] sm:$0xff] }
  0x18   : > { %204 = vst.msk [vmem:[#allocation2 + $0x89] sm:$0x1] %vm180_vm1, %v5259_v2  ;;  %205 = vst.msk [vmem:[#allocation2 + $0xa1] sm:$0x1] %vm180_vm1, %v5259_v2  ;;  %v223_v24 = vld [vmem:[%s5359_s28 + $0x30] sm:$0xff]  ;;  %v224_v26 = vld [vmem:[%s5359_s28 + $0x38] sm:$0xff]  ;;  %5232 = vmatprep.subr.mxu1 %v323_v15  ;;  %4662 = vmatprep.subr.mxu0 %v323_v15 }
  0x19   : > { %206 = vst.msk [vmem:[#allocation2 + $0xb9] sm:$0x1] %vm180_vm1, %v5259_v2  ;;  %207 = vst.msk [vmem:[#allocation2 + $0xd1] sm:$0x1] %vm180_vm1, %v5259_v2  ;;  %v241_v27 = vld [vmem:[%s5359_s28 + $0xc0] sm:$0xff]  ;;  %v242_v29 = vld [vmem:[%s5359_s28 + $0xc8] sm:$0xff]  ;;  %5240 = vmatpush3.msra.mxu1 %v323_v15  ;;  %4663 = vmatpush3.msra.mxu0 %v323_v15 }
  0x1a   : > { %208 = vst.msk [vmem:[#allocation2 + $0xe9] sm:$0x1] %vm180_vm1, %v5259_v2  ;;  %209 = vst.msk [vmem:[#allocation2 + $0x101] sm:$0x1] %vm180_vm1, %v5259_v2  ;;  %v225_v28 = vld [vmem:[%s5359_s28 + $0x40] sm:$0xff]  ;;  %5233 = vmatprep.subr.mxu1 %v322_v18  ;;  %4664 = vmatprep.subr.mxu0 %v322_v18  ;;  %v291_v34 = vld [vmem:[#allocation2 + $0x8] sm:$0xff] }
  0x1b   : > { %210 = vst.msk [vmem:[#allocation2 + $0x119] sm:$0x1] %vm180_vm1, %v5259_v2  ;;  %211 = vst.msk [vmem:[#allocation2 + $0x131] sm:$0x1] %vm180_vm1, %v5259_v2  ;;  %5241 = vmatpush3.msra.mxu1 %v322_v18  ;;  %v226_v35 = vld [vmem:[%s5359_s28 + $0x48] sm:$0xff]  ;;  %4665 = vmatpush3.msra.mxu0 %v322_v18  ;;  %v4013_v36 = vld [vmem:[%s6901_s1 + $0xb8] sm:$0xff] }
  0x1c   : > { %212 = vst.msk [vmem:[#allocation2 + $0x149] sm:$0x1] %vm180_vm1, %v5259_v2  ;;  %213 = vst.msk [vmem:[#allocation2 + $0x161] sm:$0x1] %vm180_vm1, %v5259_v2  ;;  %4714 = vmatprep.subr.mxu1 %v3973_v33  ;;  %v3972_v40 = vld [vmem:[%s6901_s1 + $0x70] sm:$0xff]  ;;  %4778 = vmatprep.subr.mxu0 %v4013_v36  ;;  %v3971_v44 = vld [vmem:[%s6901_s1 + $0x68] sm:$0xff] }
  0x1d   : > { %214 = vst.msk [vmem:[#allocation2 + $0x179] sm:$0x1] %vm180_vm1, %v5259_v2  ;;  %215 = vst.msk [vmem:[#allocation2 + $0x191] sm:$0x1] %vm180_vm1, %v5259_v2  ;;  %v4012_v42 = vld [vmem:[%s6901_s1 + $0xb0] sm:$0xff]  ;;  %v244_v48 = vld [vmem:[%s5359_s28 + $0xd8] sm:$0xff] }
  0x1e   : > { %181 = vst.msk [vmem:[#allocation2] sm:$0x1] %vm180_vm1, %v5259_v2  ;;  %198 = vst.msk [vmem:[#allocation2 + $0x198] sm:$0x1] %vm180_vm1, %v5259_v2  ;;  %v243_v45 = vld [vmem:[%s5359_s28 + $0xd0] sm:$0xff]  ;;  %v228_v50 = vld [vmem:[%s5359_s28 + $0x58] sm:$0xff] }
  0x1f   : > { %175 = vst.msk [vmem:[#allocation2 + $0x10] sm:$0x3] %vm174_vm2, %v5259_v2  ;;  %179 = vst.msk [vmem:[#allocation2 + $0x1a8] sm:$0x3] %vm174_vm2, %v5259_v2  ;;  %v227_v47 = vld [vmem:[%s5359_s28 + $0x50] sm:$0xff]  ;;  %v245_v51 = vld [vmem:[%s5359_s28 + $0xe0] sm:$0xff] }
  0x20   : > { %199 = vst.msk [vmem:[#allocation2 + $0x11] sm:$0x1] %vm180_vm1, %v5259_v2  ;;  %216 = vst.msk [vmem:[#allocation2 + $0x1a9] sm:$0x1] %vm180_vm1, %v5259_v2  ;;  %v229_v53 = vld [vmem:[%s5359_s28 + $0x60] sm:$0xff]  ;;  %v246_v54 = vld [vmem:[%s5359_s28 + $0xe8] sm:$0xff] }
  0x21   : > { %264 = vst.msk [vmem:[#allocation2 + $0xc1] sm:$0xff] %vm171_vm0, %v231_v6  ;;  %265 = vst.msk [vmem:[#allocation2 + $0xc9] sm:$0xff] %vm171_vm0, %v232_v7  ;;  %v4011_v55 = vld [vmem:[%s6901_s1 + $0xa8] sm:$0xff]  ;;  %v3970_v60 = vld [vmem:[%s6901_s1 + $0x60] sm:$0xff] }
  0x22   : > { %266 = vst.msk [vmem:[#allocation2 + $0xd9] sm:$0xff] %vm171_vm0, %v233_v8  ;;  %250 = vst.msk [vmem:[#allocation2 + $0x19] sm:$0xff] %vm171_vm0, %v217_v9  ;;  %v230_v57 = vld [vmem:[%s5359_s28 + $0x68] sm:$0xff]  ;;  %v4010_v62 = vld [vmem:[%s6901_s1 + $0xa0] sm:$0xff] }
  0x23   : > { %267 = vst.msk [vmem:[#allocation2 + $0xe1] sm:$0xff] %vm171_vm0, %v234_v10  ;;  %251 = vst.msk [vmem:[#allocation2 + $0x21] sm:$0xff] %vm171_vm0, %v218_v11  ;;  %v3969_v2 = vld [vmem:[%s6901_s1 + $0x58] sm:$0xff]  ;;  %v3968_v8 = vld [vmem:[%s6901_s1 + $0x50] sm:$0xff] }
  0x24   : > { %268 = vst.msk [vmem:[#allocation2 + $0xf1] sm:$0xff] %vm171_vm0, %v235_v13  ;;  %252 = vst.msk [vmem:[#allocation2 + $0x31] sm:$0xff] %vm171_vm0, %v219_v14  ;;  %v4009_v4 = vld [vmem:[%s6901_s1 + $0x98] sm:$0xff]  ;;  %v4008_v10 = vld [vmem:[%s6901_s1 + $0x90] sm:$0xff] }
  0x25   : > { %269 = vst.msk [vmem:[#allocation2 + $0xf9] sm:$0xff] %vm171_vm0, %v236_v16  ;;  %253 = vst.msk [vmem:[#allocation2 + $0x39] sm:$0xff] %vm171_vm0, %v220_v17  ;;  %v290_v31 = vld [vmem:[#allocation2] sm:$0xff]  ;;  %v3967_v14 = vld [vmem:[%s6901_s1 + $0x48] sm:$0xff] }
  0x26   : > { %270 = vst.msk [vmem:[#allocation2 + $0x109] sm:$0xff] %vm171_vm0, %v237_v19  ;;  %254 = vst.msk [vmem:[#allocation2 + $0x49] sm:$0xff] %vm171_vm0, %v221_v20  ;;  %4666 = vmatprep.mubr.msk.f32.mxu0 %vm171_vm0, %v290_v31  ;;  %v4007_v16 = vld [vmem:[%s6901_s1 + $0x88] sm:$0xff]  ;;  %v3966_v20 = vld [vmem:[%s6901_s1 + $0x40] sm:$0xff] }
  0x27   : > { %271 = vst.msk [vmem:[#allocation2 + $0x111] sm:$0xff] %vm171_vm0, %v238_v21  ;;  %255 = vst.msk [vmem:[#allocation2 + $0x51] sm:$0xff] %vm171_vm0, %v222_v22  ;;  %4667 = vmatmul.mubr.msk.f32.vlgmr.msra.gmra.mxu0 %vm171_vm0, %v291_v34  ;;  %v4006_v22 = vld [vmem:[%s6901_s1 + $0x80] sm:$0xff]  ;;  %v4052_v34 = vld [vmem:[%s6901_s1 + $0xf0] sm:$0xff] }
  0x28   : > { %272 = vst.msk [vmem:[#allocation2 + $0x121] sm:$0xff] %vm171_vm0, %v239_v23  ;;  %256 = vst.msk [vmem:[#allocation2 + $0x61] sm:$0xff] %vm171_vm0, %v223_v24  ;;  %v5410_v30 = vld [vmem:[#allocation2 + $0xc0] sm:$0xff]  ;;  %v5414_v32 = vld [vmem:[#allocation2 + $0xc8] sm:$0xff]  ;;  %4779 = vmatpush3.msra.mxu0 %v4013_v36 }
  0x29   : > { %273 = vst.msk [vmem:[#allocation2 + $0x129] sm:$0xff] %vm171_vm0, %v240_v25  ;;  %257 = vst.msk [vmem:[#allocation2 + $0x69] sm:$0xff] %vm171_vm0, %v224_v26  ;;  %4690 = vmatprep.mubr.msk.f32.mxu1 %vm171_vm0, %v5410_v30  ;;  %v5426_v37 = vld [vmem:[#allocation2 + $0xd8] sm:$0xff]  ;;  %4780 = vmatprep.subr.mxu0 %v4012_v42  ;;  %v683_v23 = vld [vmem:[#allocation2 + $0x1] sm:$0xff] }
  0x2a   : > { %274 = vst.msk [vmem:[#allocation2 + $0x139] sm:$0xff] %vm171_vm0, %v241_v27  ;;  %258 = vst.msk [vmem:[#allocation2 + $0x79] sm:$0xff] %vm171_vm0, %v225_v28  ;;  %4691 = vmatmul.mubr.msk.f32.vlgmr.msra.gmra.mxu1 %vm171_vm0, %v5414_v32  ;;  %v5431_v38 = vld [vmem:[#allocation2 + $0x18] sm:$0xff]  ;;  %v5434_v39 = vld [vmem:[#allocation2 + $0xe0] sm:$0xff]  ;;  %4781 = vmatpush3.msra.mxu0 %v4012_v42 }
  0x2b   : > { %275 = vst.msk [vmem:[#allocation2 + $0x141] sm:$0xff] %vm171_vm0, %v242_v29  ;;  %259 = vst.msk [vmem:[#allocation2 + $0x81] sm:$0xff] %vm171_vm0, %v226_v35  ;;  %4715 = vmatpush3.msra.mxu1 %v3973_v33  ;;  %4693 = vmatprep.mubr.msk.f32.mxu1 %vm171_vm0, %v5426_v37  ;;  %v5441_v41 = vld [vmem:[#allocation2 + $0x20] sm:$0xff]  ;;  %v5448_v43 = vld [vmem:[#allocation2 + $0xf0] sm:$0xff] }
  0x2c   : > { %4669 = vmatprep.mubr.msk.f32.mxu0 %vm171_vm0, %v5431_v38  ;;  %4716 = vmatprep.subr.mxu1 %v3972_v40  ;;  %v5456_v46 = vld [vmem:[#allocation2 + $0x30] sm:$0xff]  ;;  %276 = vst.msk [vmem:[#allocation2 + $0x151] sm:$0xff] %vm171_vm0, %v243_v45  ;;  %v5463_v49 = vld [vmem:[#allocation2 + $0xf8] sm:$0xff]  ;;  %260 = vst.msk [vmem:[#allocation2 + $0x91] sm:$0xff] %vm171_vm0, %v227_v47 }
  0x2d   : > { %4670 = vmatmul.mubr.msk.f32.gmra.mxu0 %vm171_vm0, %v5441_v41  ;;  %4717 = vmatpush3.msra.mxu1 %v3972_v40  ;;  %277 = vst.msk [vmem:[#allocation2 + $0x159] sm:$0xff] %vm171_vm0, %v244_v48  ;;  %v5471_v52 = vld [vmem:[#allocation2 + $0x38] sm:$0xff]  ;;  %261 = vst.msk [vmem:[#allocation2 + $0x99] sm:$0xff] %vm171_vm0, %v228_v50  ;;  %v5482_v56 = vld [vmem:[#allocation2 + $0x108] sm:$0xff] }
  0x2e   : > { %4694 = vmatmul.mubr.msk.f32.gmra.mxu1 %vm171_vm0, %v5434_v39  ;;  %278 = vst.msk [vmem:[#allocation2 + $0x169] sm:$0xff] %vm171_vm0, %v245_v51  ;;  %4672 = vmatprep.mubr.msk.f32.mxu0 %vm171_vm0, %v5456_v46  ;;  %262 = vst.msk [vmem:[#allocation2 + $0xa9] sm:$0xff] %vm171_vm0, %v229_v53  ;;  %v5489_v58 = vld [vmem:[#allocation2 + $0x48] sm:$0xff]  ;;  %v5494_v59 = vld [vmem:[#allocation2 + $0x110] sm:$0xff] }
  0x2f   : > { %4696 = vmatprep.mubr.msk.f32.mxu1 %vm171_vm0, %v5448_v43  ;;  %279 = vst.msk [vmem:[#allocation2 + $0x171] sm:$0xff] %vm171_vm0, %v246_v54  ;;  %4718 = vmatprep.subr.mxu1 %v3971_v44  ;;  %263 = vst.msk [vmem:[#allocation2 + $0xb1] sm:$0xff] %vm171_vm0, %v230_v57  ;;  %v5501_v61 = vld [vmem:[#allocation2 + $0x50] sm:$0xff]  ;;  %v5508_v63 = vld [vmem:[#allocation2 + $0x120] sm:$0xff] }
  0x30   : > { %4719 = vmatpush3.msra.mxu1 %v3971_v44  ;;  %4782 = vmatprep.subr.mxu0 %v4011_v55  ;;  %v5512_v0 = vld [vmem:[#allocation2 + $0x60] sm:$0xff]  ;;  %v5516_v1 = vld [vmem:[#allocation2 + $0x128] sm:$0xff]  ;;  %v4053_v26 = vld [vmem:[%s6901_s1 + $0xf8] sm:$0xff] }
  0x31   : > { %4673 = vmatmul.mubr.msk.f32.gmra.mxu0 %vm171_vm0, %v5471_v52  ;;  %4720 = vmatprep.subr.mxu1 %v3970_v60  ;;  %v5523_v3 = vld [vmem:[#allocation2 + $0x68] sm:$0xff]  ;;  %v5530_v5 = vld [vmem:[#allocation2 + $0x138] sm:$0xff]  ;;  %v4092_v42 = vld [vmem:[%s6901_s1 + $0x130] sm:$0xff] }
  0x32   : > { %4697 = vmatmul.mubr.msk.f32.gmra.mxu1 %vm171_vm0, %v5463_v49  ;;  %4783 = vmatpush3.msra.mxu0 %v4011_v55  ;;  %v5534_v6 = vld [vmem:[#allocation2 + $0x78] sm:$0xff]  ;;  %v5538_v7 = vld [vmem:[#allocation2 + $0x140] sm:$0xff]  ;;  %v684_v25 = vld [vmem:[#allocation2 + $0x9] sm:$0xff] }
  0x33   : > { %4699 = vmatprep.mubr.msk.f32.mxu1 %vm171_vm0, %v5482_v56  ;;  %4675 = vmatprep.mubr.msk.f32.mxu0 %vm171_vm0, %v5489_v58  ;;  %v5545_v9 = vld [vmem:[#allocation2 + $0x80] sm:$0xff]  ;;  %v5552_v11 = vld [vmem:[#allocation2 + $0x150] sm:$0xff]  ;;  %v4093_v28 = vld [vmem:[%s6901_s1 + $0x138] sm:$0xff] }
  0x34   : > { %4721 = vmatpush3.msra.mxu1 %v3970_v60  ;;  %4784 = vmatprep.subr.mxu0 %v4010_v62  ;;  %v5556_v12 = vld [vmem:[#allocation2 + $0x90] sm:$0xff]  ;;  %v5560_v13 = vld [vmem:[#allocation2 + $0x158] sm:$0xff]  ;;  %v1077_v24 = vld [vmem:[#allocation2 + $0x2] sm:$0xff] }
  0x35   : > { %4676 = vmatmul.mubr.msk.f32.gmra.mxu0 %vm171_vm0, %v5501_v61  ;;  %4722 = vmatprep.subr.mxu1 %v3969_v2  ;;  %v5567_v15 = vld [vmem:[#allocation2 + $0x98] sm:$0xff]  ;;  %v5574_v17 = vld [vmem:[#allocation2 + $0x168] sm:$0xff]  ;;  %v4050_v53 = vld [vmem:[%s6901_s1 + $0xe0] sm:$0xff] }
  0x36   : > { %4700 = vmatmul.mubr.msk.f32.gmra.mxu1 %vm171_vm0, %v5494_v59  ;;  %4785 = vmatpush3.msra.mxu0 %v4010_v62  ;;  %v5578_v18 = vld [vmem:[#allocation2 + $0xa8] sm:$0xff]  ;;  %v5582_v19 = vld [vmem:[#allocation2 + $0x170] sm:$0xff]  ;;  %v5608_v29 = vld [vmem:[#allocation2 + $0x19] sm:$0xff] }
  0x37   : > { %4702 = vmatprep.mubr.msk.f32.mxu1 %vm171_vm0, %v5508_v63  ;;  %4678 = vmatprep.mubr.msk.f32.mxu0 %vm171_vm0, %v5512_v0  ;;  %6935 = vst [vmem:[#allocation3_spill] sm:$0xff] %v5582_v19  ;;  %v5589_v21 = vld [vmem:[#allocation2 + $0xb0] sm:$0xff]  ;;  %v5611_v31 = vld [vmem:[#allocation2 + $0x1a] sm:$0xff]  ;;  %v5621_v35 = vld [vmem:[#allocation2 + $0x22] sm:$0xff] }
  0x38   : > { %4723 = vmatpush3.msra.mxu1 %v3969_v2  ;;  %4786 = vmatprep.subr.mxu0 %v4009_v4  ;;  %v1078_v27 = vld [vmem:[#allocation2 + $0xa] sm:$0xff]  ;;  %6936 = vst [vmem:[#allocation4_spill] sm:$0xff] %v5611_v31  ;;  %v5614_v33 = vld [vmem:[#allocation2 + $0x21] sm:$0xff]  ;;  %6937 = vst [vmem:[#allocation5_spill] sm:$0xff] %v5621_v35 }
  0x39   : > { %4679 = vmatmul.mubr.msk.f32.gmra.mxu0 %vm171_vm0, %v5523_v3  ;;  %4724 = vmatprep.subr.mxu1 %v3968_v8  ;;  %v5623_v36 = vld [vmem:[#allocation2 + $0x31] sm:$0xff]  ;;  %v4051_v44 = vld [vmem:[%s6901_s1 + $0xe8] sm:$0xff]  ;;  %v5641_v45 = vld [vmem:[#allocation2 + $0x39] sm:$0xff] }
  0x3a   : > { %4703 = vmatmul.mubr.msk.f32.gmra.mxu1 %vm171_vm0, %v5516_v1  ;;  %4787 = vmatpush3.msra.mxu0 %v4009_v4  ;;  %v5627_v40 = vld [vmem:[#allocation2 + $0x32] sm:$0xff]  ;;  %v5645_v47 = vld [vmem:[#allocation2 + $0x3a] sm:$0xff]  ;;  %v5647_v48 = vld [vmem:[#allocation2 + $0x49] sm:$0xff] }
  0x3b   : > { %4705 = vmatprep.mubr.msk.f32.mxu1 %vm171_vm0, %v5530_v5  ;;  %4681 = vmatprep.mubr.msk.f32.mxu0 %vm171_vm0, %v5534_v6  ;;  %6938 = vst [vmem:[#allocation6_spill] sm:$0xff] %v5627_v40  ;;  %6939 = vst [vmem:[#allocation7_spill] sm:$0xff] %v5645_v47  ;;  %v5649_v50 = vld [vmem:[#allocation2 + $0x4a] sm:$0xff]  ;;  %v5667_v55 = vld [vmem:[#allocation2 + $0x52] sm:$0xff] }
  0x3c   : > { %4725 = vmatpush3.msra.mxu1 %v3968_v8  ;;  %4788 = vmatprep.subr.mxu0 %v4008_v10  ;;  %6940 = vst [vmem:[#allocation8_spill] sm:$0xff] %v5649_v50  ;;  %v4091_v51 = vld [vmem:[%s6901_s1 + $0x128] sm:$0xff]  ;;  %v5663_v54 = vld [vmem:[#allocation2 + $0x51] sm:$0xff]  ;;  %6941 = vst [vmem:[#allocation9_spill] sm:$0xff] %v5667_v55 }
  0x3d   : > { %4682 = vmatmul.mubr.msk.f32.gmra.mxu0 %vm171_vm0, %v5545_v9  ;;  %4726 = vmatprep.subr.mxu1 %v3967_v14  ;;  %v5669_v57 = vld [vmem:[#allocation2 + $0x61] sm:$0xff]  ;;  %v247_v60 = vld [vmem:[%s5359_s28 + $0xf0] sm:$0xff]  ;;  %v248_v2 = vld [vmem:[%s5359_s28 + $0xf8] sm:$0xff] }
  0x3e   : > { %4706 = vmatmul.mubr.msk.f32.gmra.mxu1 %vm171_vm0, %v5538_v7  ;;  %4789 = vmatpush3.msra.mxu0 %v4008_v10  ;;  %v5672_v62 = vld [vmem:[#allocation2 + $0x62] sm:$0xff]  ;;  %280 = vst.msk [vmem:[#allocation2 + $0x181] sm:$0xff] %vm171_vm0, %v247_v60  ;;  %v4049_v8 = vld [vmem:[%s6901_s1 + $0xd8] sm:$0xff]  ;;  %281 = vst.msk [vmem:[#allocation2 + $0x189] sm:$0xff] %vm171_vm0, %v248_v2 }
  0x3f   : > { %4708 = vmatprep.mubr.msk.f32.mxu1 %vm171_vm0, %v5552_v11  ;;  %4684 = vmatprep.mubr.msk.f32.mxu0 %vm171_vm0, %v5556_v12  ;;  %6942 = vst [vmem:[#allocation10_spill] sm:$0xff] %v5672_v62  ;;  %v4090_v4 = vld [vmem:[%s6901_s1 + $0x120] sm:$0xff]  ;;  %v5689_v10 = vld [vmem:[#allocation2 + $0x69] sm:$0xff] }
  0x40   : > { %4727 = vmatpush3.msra.mxu1 %v3967_v14  ;;  %4790 = vmatprep.subr.mxu0 %v4007_v16  ;;  %v5693_v14 = vld [vmem:[#allocation2 + $0x6a] sm:$0xff]  ;;  %v4046_v2 = vld [vmem:[%s6901_s1 + $0xc0] sm:$0xff] }
  0x41   : > { %4685 = vmatmul.mubr.msk.f32.gmra.mxu0 %vm171_vm0, %v5567_v15  ;;  %4728 = vmatprep.subr.mxu1 %v3966_v20  ;;  %6943 = vst [vmem:[#allocation11_spill] sm:$0xff] %v5693_v14  ;;  %v4087_v60 = vld [vmem:[%s6901_s1 + $0x108] sm:$0xff] }
  0x42   : > { %4709 = vmatmul.mubr.msk.f32.gmra.mxu1 %vm171_vm0, %v5560_v13  ;;  %4791 = vmatpush3.msra.mxu0 %v4007_v16  ;;  %v5695_v16 = vld [vmem:[#allocation2 + $0x79] sm:$0xff] }
  0x43   : > { %4711 = vmatprep.mubr.msk.f32.mxu1 %vm171_vm0, %v5574_v17  ;;  %4687 = vmatprep.mubr.msk.f32.mxu0 %vm171_vm0, %v5578_v18 }
  0x44   : > { %4729 = vmatpush3.msra.mxu1 %v3966_v20  ;;  %4792 = vmatprep.subr.mxu0 %v4006_v22  ;;  %v5697_v20 = vld [vmem:[#allocation2 + $0x7a] sm:$0xff] }
  0x45   : > { %4688 = vmatmul.mubr.msk.f32.gmra.mxu0 %vm171_vm0, %v5589_v21  ;;  %4842 = vmatprep.subr.mxu1 %v4053_v26  ;;  %6944 = vst [vmem:[#allocation12_spill] sm:$0xff] %v5697_v20 }
  0x46   : > { %4712 = vmatmul.mubr.msk.f32.gmra.mxu1 %vm171_vm0, %v5582_v19  ;;  %4793 = vmatpush3.msra.mxu0 %v4006_v22  ;;  %v4089_v22 = vld [vmem:[%s6901_s1 + $0x118] sm:$0xff]  ;;  %v5890_v19 = vld [vmem:[#allocation2 + $0x16a] sm:$0xff] }
  0x47   : > { %4730 = vmatprep.mubr.msk.f32.mxu1 %vm171_vm0, %v683_v23  ;;  %4794 = vmatprep.mubr.msk.f32.mxu0 %vm171_vm0, %v1077_v24  ;;  %v4048_v23 = vld [vmem:[%s6901_s1 + $0xd0] sm:$0xff]  ;;  %v5711_v24 = vld [vmem:[#allocation2 + $0x81] sm:$0xff]  ;;  %6963 = vst [vmem:[#allocation31_spill] sm:$0xff] %v5890_v19 }
  0x48   : > { %4906 = vmatprep.subr.mxu0 %v4093_v28 }
  0x49   : > { %4795 = vmatmul.mubr.msk.f32.vlgmr.msra.gmra.mxu0 %vm171_vm0, %v1078_v27  ;;  %v5719_v27 = vld [vmem:[#allocation2 + $0x92] sm:$0xff] }
  0x4a   : > { %4731 = vmatmul.mubr.msk.f32.vlgmr.msra.gmra.mxu1 %vm171_vm0, %v684_v25  ;;  %4907 = vmatpush3.msra.mxu0 %v4093_v28  ;;  %v5715_v25 = vld [vmem:[#allocation2 + $0x82] sm:$0xff]  ;;  %6946 = vst [vmem:[#allocation14_spill] sm:$0xff] %v5719_v27  ;;  %v4088_v28 = vld [vmem:[%s6901_s1 + $0x110] sm:$0xff] }
  0x4b   : > { %4843 = vmatpush3.msra.mxu1 %v4053_v26  ;;  %4733 = vmatprep.mubr.msk.f32.mxu1 %vm171_vm0, %v5608_v29  ;;  %6945 = vst [vmem:[#allocation13_spill] sm:$0xff] %v5715_v25  ;;  %v5717_v26 = vld [vmem:[#allocation2 + $0x91] sm:$0xff] }
  0x4c   : > { %4797 = vmatprep.mubr.msk.f32.mxu0 %vm171_vm0, %v5611_v31  ;;  %4844 = vmatprep.subr.mxu1 %v4052_v34  ;;  %v5888_v31 = vld [vmem:[#allocation2 + $0x169] sm:$0xff] }
  0x4d   : > { %4798 = vmatmul.mubr.msk.f32.gmra.mxu0 %vm171_vm0, %v5621_v35  ;;  %4845 = vmatpush3.msra.mxu1 %v4052_v34  ;;  %v4047_v34 = vld [vmem:[%s6901_s1 + $0xc8] sm:$0xff]  ;;  %v5874_v35 = vld [vmem:[#allocation2 + $0x152] sm:$0xff] }
  0x4e   : > { %4734 = vmatmul.mubr.msk.f32.gmra.mxu1 %vm171_vm0, %v5614_v33  ;;  %4800 = vmatprep.mubr.msk.f32.mxu0 %vm171_vm0, %v5627_v40  ;;  %v5872_v40 = vld [vmem:[#allocation2 + $0x151] sm:$0xff]  ;;  %6962 = vst [vmem:[#allocation30_spill] sm:$0xff] %v5874_v35 }
  0x4f   : > { %4736 = vmatprep.mubr.msk.f32.mxu1 %vm171_vm0, %v5623_v36  ;;  %4908 = vmatprep.subr.mxu0 %v4092_v42 }
  0x50   : > { %4846 = vmatprep.subr.mxu1 %v4051_v44  ;;  %4909 = vmatpush3.msra.mxu0 %v4092_v42  ;;  %v5733_v42 = vld [vmem:[#allocation2 + $0x99] sm:$0xff] }
  0x51   : > { %4801 = vmatmul.mubr.msk.f32.gmra.mxu0 %vm171_vm0, %v5645_v47  ;;  %4847 = vmatpush3.msra.mxu1 %v4051_v44  ;;  %v5737_v44 = vld [vmem:[#allocation2 + $0x9a] sm:$0xff] }
  0x52   : > { %4737 = vmatmul.mubr.msk.f32.gmra.mxu1 %vm171_vm0, %v5641_v45  ;;  %4803 = vmatprep.mubr.msk.f32.mxu0 %vm171_vm0, %v5649_v50  ;;  %6947 = vst [vmem:[#allocation15_spill] sm:$0xff] %v5737_v44  ;;  %v5856_v50 = vld [vmem:[#allocation2 + $0x139] sm:$0xff] }
  0x53   : > { %4739 = vmatprep.mubr.msk.f32.mxu1 %vm171_vm0, %v5647_v48  ;;  %4910 = vmatprep.subr.mxu0 %v4091_v51  ;;  %v5858_v47 = vld [vmem:[#allocation2 + $0x13a] sm:$0xff] }
  0x54   : > { %4848 = vmatprep.subr.mxu1 %v4050_v53  ;;  %4911 = vmatpush3.msra.mxu0 %v4091_v51  ;;  %v5739_v51 = vld [vmem:[#allocation2 + $0xa9] sm:$0xff]  ;;  %6960 = vst [vmem:[#allocation28_spill] sm:$0xff] %v5858_v47 }
  0x55   : > { %4804 = vmatmul.mubr.msk.f32.gmra.mxu0 %vm171_vm0, %v5667_v55  ;;  %4849 = vmatpush3.msra.mxu1 %v4050_v53  ;;  %v5741_v53 = vld [vmem:[#allocation2 + $0xaa] sm:$0xff]  ;;  %v5842_v55 = vld [vmem:[#allocation2 + $0x122] sm:$0xff] }
  0x56   : > { %4740 = vmatmul.mubr.msk.f32.gmra.mxu1 %vm171_vm0, %v5663_v54  ;;  %4806 = vmatprep.mubr.msk.f32.mxu0 %vm171_vm0, %v5672_v62  ;;  %6948 = vst [vmem:[#allocation16_spill] sm:$0xff] %v5741_v53  ;;  %v5840_v62 = vld [vmem:[#allocation2 + $0x121] sm:$0xff]  ;;  %6958 = vst [vmem:[#allocation26_spill] sm:$0xff] %v5842_v55 }
  0x57   : > { %4742 = vmatprep.mubr.msk.f32.mxu1 %vm171_vm0, %v5669_v57  ;;  %4912 = vmatprep.subr.mxu0 %v4090_v4 }
  0x58   : > { %4850 = vmatprep.subr.mxu1 %v4049_v8  ;;  %4913 = vmatpush3.msra.mxu0 %v4090_v4  ;;  %v5755_v4 = vld [vmem:[#allocation2 + $0xb1] sm:$0xff] }
  0x59   : > { %4807 = vmatmul.mubr.msk.f32.gmra.mxu0 %vm171_vm0, %v5693_v14  ;;  %4851 = vmatpush3.msra.mxu1 %v4049_v8  ;;  %v5759_v8 = vld [vmem:[#allocation2 + $0xb2] sm:$0xff]  ;;  %v5826_v14 = vld [vmem:[#allocation2 + $0x10a] sm:$0xff] }
  0x5a   : > { %4743 = vmatmul.mubr.msk.f32.gmra.mxu1 %vm171_vm0, %v5689_v10  ;;  %4809 = vmatprep.mubr.msk.f32.mxu0 %vm171_vm0, %v5697_v20  ;;  %6949 = vst [vmem:[#allocation17_spill] sm:$0xff] %v5759_v8  ;;  %v5810_v20 = vld [vmem:[#allocation2 + $0xf2] sm:$0xff]  ;;  %6956 = vst [vmem:[#allocation24_spill] sm:$0xff] %v5826_v14 }
  0x5b   : > { %4745 = vmatprep.mubr.msk.f32.mxu1 %vm171_vm0, %v5695_v16  ;;  %4914 = vmatprep.subr.mxu0 %v4089_v22  ;;  %6954 = vst [vmem:[#allocation22_spill] sm:$0xff] %v5810_v20 }
  0x5c   : > { %4852 = vmatprep.subr.mxu1 %v4048_v23  ;;  %4915 = vmatpush3.msra.mxu0 %v4089_v22  ;;  %v5761_v22 = vld [vmem:[#allocation2 + $0xc1] sm:$0xff] }
  0x5d   : > { %4810 = vmatmul.mubr.msk.f32.gmra.mxu0 %vm171_vm0, %v5715_v25  ;;  %4853 = vmatpush3.msra.mxu1 %v4048_v23  ;;  %v5763_v23 = vld [vmem:[#allocation2 + $0xc2] sm:$0xff]  ;;  %v5807_v25 = vld [vmem:[#allocation2 + $0xf1] sm:$0xff] }
  0x5e   : > { %4746 = vmatmul.mubr.msk.f32.gmra.mxu1 %vm171_vm0, %v5711_v24  ;;  %4812 = vmatprep.mubr.msk.f32.mxu0 %vm171_vm0, %v5719_v27  ;;  %6950 = vst [vmem:[#allocation18_spill] sm:$0xff] %v5763_v23  ;;  %v5787_v27 = vld [vmem:[#allocation2 + $0xda] sm:$0xff] }
  0x5f   : > { %4748 = vmatprep.mubr.msk.f32.mxu1 %vm171_vm0, %v5717_v26  ;;  %4916 = vmatprep.subr.mxu0 %v4088_v28  ;;  %6952 = vst [vmem:[#allocation20_spill] sm:$0xff] %v5787_v27 }
  0x60   : > { %4854 = vmatprep.subr.mxu1 %v4047_v34  ;;  %4917 = vmatpush3.msra.mxu0 %v4088_v28  ;;  %v4086_v28 = vld [vmem:[%s6901_s1 + $0x100] sm:$0xff] }
  0x61   : > { %4813 = vmatmul.mubr.msk.f32.gmra.mxu0 %vm171_vm0, %v5737_v44  ;;  %4855 = vmatpush3.msra.mxu1 %v4047_v34  ;;  %v5779_v34 = vld [vmem:[#allocation2 + $0xc9] sm:$0xff]  ;;  %v5785_v44 = vld [vmem:[#allocation2 + $0xd9] sm:$0xff] }
  0x62   : > { %4749 = vmatmul.mubr.msk.f32.gmra.mxu1 %vm171_vm0, %v5733_v42  ;;  %4815 = vmatprep.mubr.msk.f32.mxu0 %vm171_vm0, %v5741_v53  ;;  %v5773_v53 = vld [vmem:[%s6901_s1 + $0x178] sm:$0xff] }
  0x63   : > { %4751 = vmatprep.mubr.msk.f32.mxu1 %vm171_vm0, %v5739_v51  ;;  %4918 = vmatprep.subr.mxu0 %v4087_v60 }
  0x64   : > { %4856 = vmatprep.subr.mxu1 %v4046_v2  ;;  %4919 = vmatpush3.msra.mxu0 %v4087_v60  ;;  %v5783_v60 = vld [vmem:[#allocation2 + $0xca] sm:$0xff] }
  0x65   : > { %4816 = vmatmul.mubr.msk.f32.gmra.mxu0 %vm171_vm0, %v5759_v8  ;;  %6951 = vst [vmem:[#allocation19_spill] sm:$0xff] %v5783_v60  ;;  %4857 = vmatpush3.msra.mxu1 %v4046_v2  ;;  %v5793_v8 = vld [vmem:[%s6901_s1 + $0x1b8] sm:$0xff]  ;;  %v5801_v2 = vld [vmem:[#allocation2 + $0xe1] sm:$0xff] }
  0x66   : > { %4752 = vmatmul.mubr.msk.f32.gmra.mxu1 %vm171_vm0, %v5755_v4  ;;  %4818 = vmatprep.mubr.msk.f32.mxu0 %vm171_vm0, %v5763_v23  ;;  %v5805_v23 = vld [vmem:[#allocation2 + $0xe2] sm:$0xff] }
  0x67   : > { %4754 = vmatprep.mubr.msk.f32.mxu1 %vm171_vm0, %v5761_v22  ;;  %4920 = vmatprep.subr.mxu0 %v4086_v28  ;;  %6953 = vst [vmem:[#allocation21_spill] sm:$0xff] %v5805_v23 }
  0x68   : > { %4970 = vmatprep.subr.mxu1 %v5773_v53  ;;  %4921 = vmatpush3.msra.mxu0 %v4086_v28  ;;  %v5818_v28 = vld [vmem:[#allocation2 + $0xf9] sm:$0xff] }
  0x69   : > { %4819 = vmatmul.mubr.msk.f32.gmra.mxu0 %vm171_vm0, %v5783_v60  ;;  %5034 = vmatprep.subr.mxu0 %v5793_v8  ;;  %v5824_v60 = vld [vmem:[#allocation2 + $0x109] sm:$0xff] }
  0x6a   : > { %4755 = vmatmul.mubr.msk.f32.gmra.mxu1 %vm171_vm0, %v5779_v34  ;;  %4821 = vmatprep.mubr.msk.f32.mxu0 %vm171_vm0, %v5787_v27  ;;  %v5822_v27 = vld [vmem:[#allocation2 + $0xfa] sm:$0xff] }
  0x6b   : > { %4757 = vmatprep.mubr.msk.f32.mxu1 %vm171_vm0, %v5785_v44  ;;  %6955 = vst [vmem:[#allocation23_spill] sm:$0xff] %v5822_v27 }
  0x6d   : > { %4822 = vmatmul.mubr.msk.f32.gmra.mxu0 %vm171_vm0, %v5805_v23  ;;  %v5834_v23 = vld [vmem:[#allocation2 + $0x111] sm:$0xff] }
  0x6e   : > { %4758 = vmatmul.mubr.msk.f32.gmra.mxu1 %vm171_vm0, %v5801_v2  ;;  %4824 = vmatprep.mubr.msk.f32.mxu0 %vm171_vm0, %v5810_v20  ;;  %v5838_v20 = vld [vmem:[#allocation2 + $0x112] sm:$0xff] }
  0x6f   : > { %4760 = vmatprep.mubr.msk.f32.mxu1 %vm171_vm0, %v5807_v25  ;;  %6957 = vst [vmem:[#allocation25_spill] sm:$0xff] %v5838_v20 }
  0x71   : > { %4825 = vmatmul.mubr.msk.f32.gmra.mxu0 %vm171_vm0, %v5822_v27  ;;  %v5850_v27 = vld [vmem:[#allocation2 + $0x129] sm:$0xff] }
  0x72   : > { %4761 = vmatmul.mubr.msk.f32.gmra.mxu1 %vm171_vm0, %v5818_v28  ;;  %4827 = vmatprep.mubr.msk.f32.mxu0 %vm171_vm0, %v5826_v14  ;;  %v5854_v14 = vld [vmem:[#allocation2 + $0x12a] sm:$0xff] }
  0x73   : > { %4763 = vmatprep.mubr.msk.f32.mxu1 %vm171_vm0, %v5824_v60  ;;  %6959 = vst [vmem:[#allocation27_spill] sm:$0xff] %v5854_v14 }
  0x75   : > { %4828 = vmatmul.mubr.msk.f32.gmra.mxu0 %vm171_vm0, %v5838_v20  ;;  %v5866_v20 = vld [vmem:[#allocation2 + $0x141] sm:$0xff] }
  0x76   : > { %4764 = vmatmul.mubr.msk.f32.gmra.mxu1 %vm171_vm0, %v5834_v23  ;;  %4830 = vmatprep.mubr.msk.f32.mxu0 %vm171_vm0, %v5842_v55  ;;  %v5870_v55 = vld [vmem:[#allocation2 + $0x142] sm:$0xff] }
  0x77   : > { %4766 = vmatprep.mubr.msk.f32.mxu1 %vm171_vm0, %v5840_v62  ;;  %6961 = vst [vmem:[#allocation29_spill] sm:$0xff] %v5870_v55 }
  0x79   : > { %4831 = vmatmul.mubr.msk.f32.gmra.mxu0 %vm171_vm0, %v5854_v14  ;;  %v5882_v14 = vld [vmem:[#allocation2 + $0x159] sm:$0xff] }
  0x7a   : > { %4767 = vmatmul.mubr.msk.f32.gmra.mxu1 %vm171_vm0, %v5850_v27  ;;  %4833 = vmatprep.mubr.msk.f32.mxu0 %vm171_vm0, %v5858_v47  ;;  %v5886_v47 = vld [vmem:[#allocation2 + $0x15a] sm:$0xff] }
  0x7b   : > { %4769 = vmatprep.mubr.msk.f32.mxu1 %vm171_vm0, %v5856_v50 }
  0x7d   : > { %4834 = vmatmul.mubr.msk.f32.gmra.mxu0 %vm171_vm0, %v5870_v55  ;;  %v5898_v55 = vld [vmem:[#allocation2 + $0x171] sm:$0xff] }
  0x7e   : > { %4770 = vmatmul.mubr.msk.f32.gmra.mxu1 %vm171_vm0, %v5866_v20  ;;  %4836 = vmatprep.mubr.msk.f32.mxu0 %vm171_vm0, %v5874_v35  ;;  %v5902_v35 = vld [vmem:[#allocation2 + $0x172] sm:$0xff] }
  0x7f   : > { %4772 = vmatprep.mubr.msk.f32.mxu1 %vm171_vm0, %v5872_v40  ;;  %6964 = vst [vmem:[#allocation32_spill] sm:$0xff] %v5902_v35 }
  0x81   : > { %4837 = vmatmul.mubr.msk.f32.gmra.mxu0 %vm171_vm0, %v5886_v47 }
  0x82   : > { %4773 = vmatmul.mubr.msk.f32.gmra.mxu1 %vm171_vm0, %v5882_v14  ;;  %4839 = vmatprep.mubr.msk.f32.mxu0 %vm171_vm0, %v5890_v19  ;;  %v4132_v19 = vld [vmem:[%s6901_s1 + $0x170] sm:$0xff] }
  0x83   : > { %4775 = vmatprep.mubr.msk.f32.mxu1 %vm171_vm0, %v5888_v31 }
  0x85   : > { %4840 = vmatmul.mubr.msk.f32.gmra.mxu0 %vm171_vm0, %v5902_v35  ;;  %v4172_v35 = vld [vmem:[%s6901_s1 + $0x1b0] sm:$0xff] }
  0x86   : > { %4776 = vmatmul.mubr.msk.f32.gmra.mxu1 %vm171_vm0, %v5898_v55  ;;  %4922 = vmatprep.mubr.msk.f32.mxu0 %vm171_vm0, %v5608_v29  ;;  %v4130_v29 = vld [vmem:[%s6901_s1 + $0x160] sm:$0xff] }
  0x87   : > { %4858 = vmatprep.mubr.msk.f32.mxu1 %vm171_vm0, %v5431_v38  ;;  %v4131_v38 = vld [vmem:[%s6901_s1 + $0x168] sm:$0xff] }
  0x89   : > { %4923 = vmatmul.mubr.msk.f32.vlgmr.msra.gmra.mxu0 %vm171_vm0, %v5614_v33  ;;  %v4129_v33 = vld [vmem:[%s6901_s1 + $0x158] sm:$0xff] }
  0x8a   : > { %4859 = vmatmul.mubr.msk.f32.vlgmr.msra.gmra.mxu1 %vm171_vm0, %v5441_v41  ;;  %5035 = vmatpush3.msra.mxu0 %v5793_v8  ;;  %v4171_v41 = vld [vmem:[%s6901_s1 + $0x1a8] sm:$0xff] }
  0x8b   : > { %4971 = vmatpush3.msra.mxu1 %v5773_v53  ;;  %4861 = vmatprep.mubr.msk.f32.mxu1 %vm171_vm0, %v5456_v46  ;;  %v6982_v53 = vld [vmem:[#allocation20_spill] sm:$0xff]  ;;  %v2672_v8 = vld [vmem:[#allocation2 + $0x108] sm:$0xff] }
  0x8c   : > { %4925 = vmatprep.mubr.msk.f32.mxu0 %vm171_vm0, %v5623_v36  ;;  %4972 = vmatprep.subr.mxu1 %v4132_v19  ;;  %v4128_v36 = vld [vmem:[%s6901_s1 + $0x150] sm:$0xff] }
  0x8d   : > { %5036 = vmatprep.subr.mxu0 %v4172_v35  ;;  %4926 = vmatmul.mubr.msk.f32.gmra.mxu0 %vm171_vm0, %v5641_v45  ;;  %v4168_v45 = vld [vmem:[%s6901_s1 + $0x190] sm:$0xff] }
  0x8e   : > { %4862 = vmatmul.mubr.msk.f32.gmra.mxu1 %vm171_vm0, %v5471_v52  ;;  %4928 = vmatprep.mubr.msk.f32.mxu0 %vm171_vm0, %v5647_v48  ;;  %v4127_v48 = vld [vmem:[%s6901_s1 + $0x148] sm:$0xff] }
  0x8f   : > { %4864 = vmatprep.mubr.msk.f32.mxu1 %vm171_vm0, %v5489_v58  ;;  %4973 = vmatpush3.msra.mxu1 %v4132_v19  ;;  %v4170_v19 = vld [vmem:[%s6901_s1 + $0x1a0] sm:$0xff] }
  0x90   : > { %5037 = vmatpush3.msra.mxu0 %v4172_v35  ;;  %4974 = vmatprep.subr.mxu1 %v4131_v38  ;;  %v4169_v35 = vld [vmem:[%s6901_s1 + $0x198] sm:$0xff] }
  0x91   : > { %5038 = vmatprep.subr.mxu0 %v4171_v41  ;;  %4929 = vmatmul.mubr.msk.f32.gmra.mxu0 %vm171_vm0, %v5663_v54  ;;  %v4167_v54 = vld [vmem:[%s6901_s1 + $0x188] sm:$0xff] }
  0x92   : > { %4865 = vmatmul.mubr.msk.f32.gmra.mxu1 %vm171_vm0, %v5501_v61  ;;  %4931 = vmatprep.mubr.msk.f32.mxu0 %vm171_vm0, %v5669_v57  ;;  %v4126_v57 = vld [vmem:[%s6901_s1 + $0x140] sm:$0xff] }
  0x93   : > { %4867 = vmatprep.mubr.msk.f32.mxu1 %vm171_vm0, %v5512_v0  ;;  %4975 = vmatpush3.msra.mxu1 %v4131_v38 }
  0x94   : > { %5039 = vmatpush3.msra.mxu0 %v4171_v41  ;;  %4976 = vmatprep.subr.mxu1 %v4130_v29  ;;  %v2674_v41 = vld [vmem:[#allocation2 + $0x120] sm:$0xff] }
  0x95   : > { %5040 = vmatprep.subr.mxu0 %v4170_v19  ;;  %4932 = vmatmul.mubr.msk.f32.gmra.mxu0 %vm171_vm0, %v5689_v10  ;;  %v4166_v10 = vld [vmem:[%s6901_s1 + $0x180] sm:$0xff] }
  0x96   : > { %4868 = vmatmul.mubr.msk.f32.gmra.mxu1 %vm171_vm0, %v5523_v3  ;;  %4934 = vmatprep.mubr.msk.f32.mxu0 %vm171_vm0, %v5695_v16  ;;  %v4213_v16 = vld [vmem:[%s6901_s1 + $0x1f8] sm:$0xff] }
  0x97   : > { %4870 = vmatprep.mubr.msk.f32.mxu1 %vm171_vm0, %v5534_v6  ;;  %4977 = vmatpush3.msra.mxu1 %v4130_v29 }
  0x98   : > { %5041 = vmatpush3.msra.mxu0 %v4170_v19  ;;  %4978 = vmatprep.subr.mxu1 %v4129_v33  ;;  %v6985_v19 = vld [vmem:[#allocation23_spill] sm:$0xff] }
  0x99   : > { %5042 = vmatprep.subr.mxu0 %v4169_v35  ;;  %4935 = vmatmul.mubr.msk.f32.gmra.mxu0 %vm171_vm0, %v5711_v24  ;;  %v2668_v24 = vld [vmem:[#allocation2 + $0xd8] sm:$0xff] }
  0x9a   : > { %4871 = vmatmul.mubr.msk.f32.gmra.mxu1 %vm171_vm0, %v5545_v9  ;;  %4937 = vmatprep.mubr.msk.f32.mxu0 %vm171_vm0, %v5717_v26  ;;  %v6980_v26 = vld [vmem:[#allocation18_spill] sm:$0xff] }
  0x9b   : > { %4873 = vmatprep.mubr.msk.f32.mxu1 %vm171_vm0, %v5556_v12  ;;  %4979 = vmatpush3.msra.mxu1 %v4129_v33 }
  0x9c   : > { %5043 = vmatpush3.msra.mxu0 %v4169_v35  ;;  %4980 = vmatprep.subr.mxu1 %v4128_v36  ;;  %v6986_v35 = vld [vmem:[#allocation24_spill] sm:$0xff] }
  0x9d   : > { %5044 = vmatprep.subr.mxu0 %v4168_v45  ;;  %4938 = vmatmul.mubr.msk.f32.gmra.mxu0 %vm171_vm0, %v5733_v42  ;;  %v2669_v42 = vld [vmem:[#allocation2 + $0xe0] sm:$0xff] }
  0x9e   : > { %4874 = vmatmul.mubr.msk.f32.gmra.mxu1 %vm171_vm0, %v5567_v15  ;;  %4940 = vmatprep.mubr.msk.f32.mxu0 %vm171_vm0, %v5739_v51  ;;  %v6981_v51 = vld [vmem:[#allocation19_spill] sm:$0xff] }
  0x9f   : > { %4876 = vmatprep.mubr.msk.f32.mxu1 %vm171_vm0, %v5578_v18  ;;  %4981 = vmatpush3.msra.mxu1 %v4128_v36 }
  0xa0   : > { %5045 = vmatpush3.msra.mxu0 %v4168_v45  ;;  %4982 = vmatprep.subr.mxu1 %v4127_v48  ;;  %v2675_v45 = vld [vmem:[#allocation2 + $0x128] sm:$0xff] }
  0xa1   : > { %5046 = vmatprep.subr.mxu0 %v4167_v54  ;;  %4941 = vmatmul.mubr.msk.f32.gmra.mxu0 %vm171_vm0, %v5755_v4  ;;  %v2671_v4 = vld [vmem:[#allocation2 + $0xf8] sm:$0xff] }
  0xa2   : > { %4877 = vmatmul.mubr.msk.f32.gmra.mxu1 %vm171_vm0, %v5589_v21  ;;  %4943 = vmatprep.mubr.msk.f32.mxu0 %vm171_vm0, %v5761_v22 }
  0xa3   : > { %4879 = vmatprep.mubr.msk.f32.mxu1 %vm171_vm0, %v5410_v30  ;;  %4983 = vmatpush3.msra.mxu1 %v4127_v48  ;;  %v4253_v30 = vld [vmem:[%s6901_s1 + $0x238] sm:$0xff] }
  0xa4   : > { %5047 = vmatpush3.msra.mxu0 %v4167_v54  ;;  %4984 = vmatprep.subr.mxu1 %v4126_v57  ;;  %v2676_v54 = vld [vmem:[#allocation2 + $0x138] sm:$0xff] }
  0xa5   : > { %5048 = vmatprep.subr.mxu0 %v4166_v10  ;;  %4944 = vmatmul.mubr.msk.f32.gmra.mxu0 %vm171_vm0, %v5779_v34 }
  0xa6   : > { %4880 = vmatmul.mubr.msk.f32.gmra.mxu1 %vm171_vm0, %v5414_v32  ;;  %4946 = vmatprep.mubr.msk.f32.mxu0 %vm171_vm0, %v5785_v44  ;;  %v6074_v32 = vld [vmem:[#allocation2 + $0x180] sm:$0xff]  ;;  %v2670_v44 = vld [vmem:[#allocation2 + $0xf0] sm:$0xff] }
  0xa7   : > { %4882 = vmatprep.mubr.msk.f32.mxu1 %vm171_vm0, %v5426_v37  ;;  %4985 = vmatpush3.msra.mxu1 %v4126_v57  ;;  %v6076_v37 = vld [vmem:[#allocation2 + $0x181] sm:$0xff] }
  0xa8   : > { %5049 = vmatpush3.msra.mxu0 %v4166_v10  ;;  %5098 = vmatprep.subr.mxu1 %v4213_v16  ;;  %v6987_v10 = vld [vmem:[#allocation25_spill] sm:$0xff] }
  0xa9   : > { %5162 = vmatprep.subr.mxu0 %v4253_v30  ;;  %4947 = vmatmul.mubr.msk.f32.gmra.mxu0 %vm171_vm0, %v5801_v2 }
  0xaa   : > { %4883 = vmatmul.mubr.msk.f32.gmra.mxu1 %vm171_vm0, %v5434_v39  ;;  %4949 = vmatprep.mubr.msk.f32.mxu0 %vm171_vm0, %v5807_v25  ;;  %v6965_v39 = vld [vmem:[#allocation3_spill] sm:$0xff]  ;;  %v6979_v25 = vld [vmem:[#allocation17_spill] sm:$0xff] }
  0xab   : > { %4885 = vmatprep.mubr.msk.f32.mxu1 %vm171_vm0, %v5448_v43  ;;  %v6084_v43 = vld [vmem:[#allocation2 + $0x188] sm:$0xff] }
  0xad   : > { %4950 = vmatmul.mubr.msk.f32.gmra.mxu0 %vm171_vm0, %v5818_v28  ;;  %v2673_v28 = vld [vmem:[#allocation2 + $0x110] sm:$0xff] }
  0xae   : > { %4886 = vmatmul.mubr.msk.f32.gmra.mxu1 %vm171_vm0, %v5463_v49  ;;  %4952 = vmatprep.mubr.msk.f32.mxu0 %vm171_vm0, %v5824_v60  ;;  %v6088_v49 = vld [vmem:[#allocation2 + $0x189] sm:$0xff] }
  0xaf   : > { %4888 = vmatprep.mubr.msk.f32.mxu1 %vm171_vm0, %v5482_v56  ;;  %v6966_v56 = vld [vmem:[#allocation4_spill] sm:$0xff]  ;;  %v6984_v60 = vld [vmem:[#allocation22_spill] sm:$0xff] }
  0xb1   : > { %4953 = vmatmul.mubr.msk.f32.gmra.mxu0 %vm171_vm0, %v5834_v23  ;;  %v6983_v23 = vld [vmem:[#allocation21_spill] sm:$0xff] }
  0xb2   : > { %4889 = vmatmul.mubr.msk.f32.gmra.mxu1 %vm171_vm0, %v5494_v59  ;;  %4955 = vmatprep.mubr.msk.f32.mxu0 %vm171_vm0, %v5840_v62  ;;  %v6967_v59 = vld [vmem:[#allocation5_spill] sm:$0xff]  ;;  %v6977_v62 = vld [vmem:[#allocation15_spill] sm:$0xff] }
  0xb3   : > { %4891 = vmatprep.mubr.msk.f32.mxu1 %vm171_vm0, %v5508_v63  ;;  %v4212_v63 = vld [vmem:[%s6901_s1 + $0x1f0] sm:$0xff] }
  0xb5   : > { %4956 = vmatmul.mubr.msk.f32.gmra.mxu0 %vm171_vm0, %v5850_v27  ;;  %v4246_v27 = vld [vmem:[%s6901_s1 + $0x200] sm:$0xff] }
  0xb6   : > { %4892 = vmatmul.mubr.msk.f32.gmra.mxu1 %vm171_vm0, %v5516_v1  ;;  %4958 = vmatprep.mubr.msk.f32.mxu0 %vm171_vm0, %v5856_v50  ;;  %v4252_v1 = vld [vmem:[%s6901_s1 + $0x230] sm:$0xff]  ;;  %v6976_v50 = vld [vmem:[#allocation14_spill] sm:$0xff] }
  0xb7   : > { %4894 = vmatprep.mubr.msk.f32.mxu1 %vm171_vm0, %v5530_v5  ;;  %v6968_v5 = vld [vmem:[#allocation6_spill] sm:$0xff] }
  0xb9   : > { %4959 = vmatmul.mubr.msk.f32.gmra.mxu0 %vm171_vm0, %v5866_v20  ;;  %v2667_v20 = vld [vmem:[#allocation2 + $0xc8] sm:$0xff] }
  0xba   : > { %4895 = vmatmul.mubr.msk.f32.gmra.mxu1 %vm171_vm0, %v5538_v7  ;;  %4961 = vmatprep.mubr.msk.f32.mxu0 %vm171_vm0, %v5872_v40  ;;  %v6970_v7 = vld [vmem:[#allocation8_spill] sm:$0xff]  ;;  %v6975_v40 = vld [vmem:[#allocation13_spill] sm:$0xff] }
  0xbb   : > { %4897 = vmatprep.mubr.msk.f32.mxu1 %vm171_vm0, %v5552_v11  ;;  %v4251_v11 = vld [vmem:[%s6901_s1 + $0x228] sm:$0xff] }
  0xbd   : > { %4962 = vmatmul.mubr.msk.f32.gmra.mxu0 %vm171_vm0, %v5882_v14  ;;  %v6978_v14 = vld [vmem:[#allocation16_spill] sm:$0xff] }
  0xbe   : > { %4898 = vmatmul.mubr.msk.f32.gmra.mxu1 %vm171_vm0, %v5560_v13  ;;  %4964 = vmatprep.mubr.msk.f32.mxu0 %vm171_vm0, %v5888_v31  ;;  %v6972_v13 = vld [vmem:[#allocation10_spill] sm:$0xff]  ;;  %v6974_v31 = vld [vmem:[#allocation12_spill] sm:$0xff] }
  0xbf   : > { %4900 = vmatprep.mubr.msk.f32.mxu1 %vm171_vm0, %v5574_v17  ;;  %v6973_v17 = vld [vmem:[#allocation11_spill] sm:$0xff] }
  0xc1   : > { %4965 = vmatmul.mubr.msk.f32.gmra.mxu0 %vm171_vm0, %v5898_v55  ;;  %v2666_v55 = vld [vmem:[#allocation2 + $0xc0] sm:$0xff] }
  0xc2   : > { %4901 = vmatmul.mubr.msk.f32.gmra.mxu1 %vm171_vm0, %v6965_v39  ;;  %4967 = vmatprep.mubr.msk.f32.mxu0 %vm171_vm0, %v6076_v37 }
  0xc3   : > { %4903 = vmatprep.mubr.msk.f32.mxu1 %vm171_vm0, %v6074_v32 }
  0xc5   : > { %4968 = vmatmul.mubr.msk.f32.gmra.mxu0 %vm171_vm0, %v6088_v49 }
  0xc6   : > { %4904 = vmatmul.mubr.msk.f32.gmra.mxu1 %vm171_vm0, %v6084_v43  ;;  %5050 = vmatprep.mubr.msk.f32.mxu0 %vm171_vm0, %v5456_v46  ;;  %v6969_v46 = vld [vmem:[#allocation7_spill] sm:$0xff] }
  0xc7   : > { %4986 = vmatprep.mubr.msk.f32.mxu1 %vm171_vm0, %v6966_v56  ;;  %v2677_v56 = vld [vmem:[#allocation2 + $0x140] sm:$0xff] }
  0xc9   : > { %5051 = vmatmul.mubr.msk.f32.vlgmr.msra.gmra.mxu0 %vm171_vm0, %v5471_v52  ;;  %v4211_v52 = vld [vmem:[%s6901_s1 + $0x1e8] sm:$0xff] }
  0xca   : > { %4987 = vmatmul.mubr.msk.f32.vlgmr.msra.gmra.mxu1 %vm171_vm0, %v6967_v59  ;;  %5163 = vmatpush3.msra.mxu0 %v4253_v30  ;;  %v6988_v30 = vld [vmem:[#allocation26_spill] sm:$0xff] }
  0xcb   : > { %5099 = vmatpush3.msra.mxu1 %v4213_v16  ;;  %4989 = vmatprep.mubr.msk.f32.mxu1 %vm171_vm0, %v6968_v5  ;;  %v6989_v5 = vld [vmem:[#allocation27_spill] sm:$0xff] }
  0xcc   : > { %5053 = vmatprep.mubr.msk.f32.mxu0 %vm171_vm0, %v5489_v58  ;;  %5100 = vmatprep.subr.mxu1 %v4212_v63  ;;  %v6971_v58 = vld [vmem:[#allocation9_spill] sm:$0xff] }
  0xcd   : > { %5164 = vmatprep.subr.mxu0 %v4252_v1  ;;  %5054 = vmatmul.mubr.msk.f32.gmra.mxu0 %vm171_vm0, %v5501_v61  ;;  %v4210_v61 = vld [vmem:[%s6901_s1 + $0x1e0] sm:$0xff] }
  0xce   : > { %4990 = vmatmul.mubr.msk.f32.gmra.mxu1 %vm171_vm0, %v6969_v46  ;;  %5056 = vmatprep.mubr.msk.f32.mxu0 %vm171_vm0, %v5512_v0  ;;  %v4250_v0 = vld [vmem:[%s6901_s1 + $0x220] sm:$0xff] }
  0xcf   : > { %4992 = vmatprep.mubr.msk.f32.mxu1 %vm171_vm0, %v6970_v7  ;;  %5101 = vmatpush3.msra.mxu1 %v4212_v63  ;;  %v2678_v63 = vld [vmem:[#allocation2 + $0x150] sm:$0xff] }
  0xd0   : > { %5165 = vmatpush3.msra.mxu0 %v4252_v1  ;;  %5102 = vmatprep.subr.mxu1 %v4211_v52 }
  0xd1   : > { %5166 = vmatprep.subr.mxu0 %v4251_v11  ;;  %5057 = vmatmul.mubr.msk.f32.gmra.mxu0 %vm171_vm0, %v5523_v3  ;;  %v4209_v3 = vld [vmem:[%s6901_s1 + $0x1d8] sm:$0xff] }
  0xd2   : > { %4993 = vmatmul.mubr.msk.f32.gmra.mxu1 %vm171_vm0, %v6971_v58  ;;  %5059 = vmatprep.mubr.msk.f32.mxu0 %vm171_vm0, %v5534_v6  ;;  %v4249_v6 = vld [vmem:[%s6901_s1 + $0x218] sm:$0xff] }
  0xd3   : > { %4995 = vmatprep.mubr.msk.f32.mxu1 %vm171_vm0, %v6972_v13  ;;  %5103 = vmatpush3.msra.mxu1 %v4211_v52  ;;  %v6990_v52 = vld [vmem:[#allocation28_spill] sm:$0xff] }
  0xd4   : > { %5167 = vmatpush3.msra.mxu0 %v4251_v11  ;;  %5104 = vmatprep.subr.mxu1 %v4210_v61  ;;  %v2679_v11 = vld [vmem:[#allocation2 + $0x158] sm:$0xff] }
  0xd5   : > { %5168 = vmatprep.subr.mxu0 %v4250_v0  ;;  %5060 = vmatmul.mubr.msk.f32.gmra.mxu0 %vm171_vm0, %v5545_v9  ;;  %v4208_v9 = vld [vmem:[%s6901_s1 + $0x1d0] sm:$0xff] }
  0xd6   : > { %4996 = vmatmul.mubr.msk.f32.gmra.mxu1 %vm171_vm0, %v6973_v17  ;;  %5062 = vmatprep.mubr.msk.f32.mxu0 %vm171_vm0, %v5556_v12  ;;  %v4248_v12 = vld [vmem:[%s6901_s1 + $0x210] sm:$0xff] }
  0xd7   : > { %4998 = vmatprep.mubr.msk.f32.mxu1 %vm171_vm0, %v6974_v31  ;;  %5105 = vmatpush3.msra.mxu1 %v4210_v61  ;;  %v2680_v61 = vld [vmem:[#allocation2 + $0x168] sm:$0xff] }
  0xd8   : > { %5169 = vmatpush3.msra.mxu0 %v4250_v0  ;;  %5106 = vmatprep.subr.mxu1 %v4209_v3  ;;  %v6991_v0 = vld [vmem:[#allocation29_spill] sm:$0xff] }
  0xd9   : > { %5170 = vmatprep.subr.mxu0 %v4249_v6  ;;  %5063 = vmatmul.mubr.msk.f32.gmra.mxu0 %vm171_vm0, %v5567_v15  ;;  %v4207_v15 = vld [vmem:[%s6901_s1 + $0x1c8] sm:$0xff] }
  0xda   : > { %4999 = vmatmul.mubr.msk.f32.gmra.mxu1 %vm171_vm0, %v6975_v40  ;;  %5065 = vmatprep.mubr.msk.f32.mxu0 %vm171_vm0, %v5578_v18  ;;  %v4247_v18 = vld [vmem:[%s6901_s1 + $0x208] sm:$0xff] }
  0xdb   : > { %5001 = vmatprep.mubr.msk.f32.mxu1 %vm171_vm0, %v6976_v50  ;;  %5107 = vmatpush3.msra.mxu1 %v4209_v3  ;;  %v6992_v3 = vld [vmem:[#allocation30_spill] sm:$0xff] }
  0xdc   : > { %5171 = vmatpush3.msra.mxu0 %v4249_v6  ;;  %5108 = vmatprep.subr.mxu1 %v4208_v9  ;;  %v2681_v6 = vld [vmem:[#allocation2 + $0x170] sm:$0xff] }
  0xdd   : > { %5172 = vmatprep.subr.mxu0 %v4248_v12  ;;  %5066 = vmatmul.mubr.msk.f32.gmra.mxu0 %vm171_vm0, %v5589_v21  ;;  %v4206_v21 = vld [vmem:[%s6901_s1 + $0x1c0] sm:$0xff] }
  0xde   : > { %5002 = vmatmul.mubr.msk.f32.gmra.mxu1 %vm171_vm0, %v6977_v62  ;;  %5068 = vmatprep.mubr.msk.f32.mxu0 %vm171_vm0, %v2666_v55  ;;  %v6282_v62 = vld [vmem:[#allocation2 + $0x182] sm:$0xff] }
  0xdf   : > { %5004 = vmatprep.mubr.msk.f32.mxu1 %vm171_vm0, %v6978_v14  ;;  %5109 = vmatpush3.msra.mxu1 %v4208_v9  ;;  %v2684_v14 = vld [vmem:[#allocation2 + $0x198] sm:$0xff] }
  0xe0   : > { %5173 = vmatpush3.msra.mxu0 %v4248_v12  ;;  %5110 = vmatprep.subr.mxu1 %v4207_v15  ;;  %v6993_v12 = vld [vmem:[#allocation31_spill] sm:$0xff] }
  0xe1   : > { %5174 = vmatprep.subr.mxu0 %v4247_v18  ;;  %5069 = vmatmul.mubr.msk.f32.gmra.mxu0 %vm171_vm0, %v2667_v20 }
  0xe2   : > { %5005 = vmatmul.mubr.msk.f32.gmra.mxu1 %vm171_vm0, %v6979_v25  ;;  %5071 = vmatprep.mubr.msk.f32.mxu0 %vm171_vm0, %v2668_v24  ;;  %v6296_v24 = vld [vmem:[#allocation2 + $0x18a] sm:$0xff]  ;;  %v2685_v25 = vld [vmem:[#allocation2 + $0x1a0] sm:$0xff] }
  0xe3   : > { %5007 = vmatprep.mubr.msk.f32.mxu1 %vm171_vm0, %v6980_v26  ;;  %5111 = vmatpush3.msra.mxu1 %v4207_v15 }
  0xe4   : > { %5175 = vmatpush3.msra.mxu0 %v4247_v18  ;;  %5112 = vmatprep.subr.mxu1 %v4206_v21 }
  0xe5   : > { %5176 = vmatprep.subr.mxu0 %v4246_v27  ;;  %5072 = vmatmul.mubr.msk.f32.gmra.mxu0 %vm171_vm0, %v2669_v42 }
  0xe6   : > { %5008 = vmatmul.mubr.msk.f32.gmra.mxu1 %vm171_vm0, %v6981_v51  ;;  %5074 = vmatprep.mubr.msk.f32.mxu0 %vm171_vm0, %v2670_v44  ;;  %v3049_v44 = vld [vmem:[#allocation2 + $0x39] sm:$0xff] }
  0xe7   : > { %5010 = vmatprep.mubr.msk.f32.mxu1 %vm171_vm0, %v6982_v53  ;;  %5113 = vmatpush3.msra.mxu1 %v4206_v21  ;;  %v6203_v34 = vpop.f32.mrf.mxu0  ;;  %v3048_v21 = vld [vmem:[#allocation2 + $0x31] sm:$0xff]  ;;  %v6314_v51 = vld [vmem:[%s6902_s2] ss:$0 sm:$0xff] }
  0xe8   : > { %5177 = vmatpush3.msra.mxu0 %v4246_v27  ;;  %v3442_v27 = vld [vmem:[#allocation2 + $0x32] sm:$0xff] }
  0xe9   : > { %5075 = vmatmul.mubr.msk.f32.gmra.mxu0 %vm171_vm0, %v2671_v4  ;;  %v6211_v38 = vpop.f32.mrf.mxu0  ;;  %v3443_v4 = vld [vmem:[#allocation2 + $0x3a] sm:$0xff] }
  0xea   : > { %v6199_v22 = vpop.f32.mrf.mxu1  ;;  %5011 = vmatmul.mubr.msk.f32.gmra.mxu1 %vm171_vm0, %v6983_v23  ;;  %5077 = vmatprep.mubr.msk.f32.mxu0 %vm171_vm0, %v2672_v8  ;;  %v3050_v8 = vld [vmem:[#allocation2 + $0x49] sm:$0xff]  ;;  %v652_v23 = vadd.f32 %v6203_v34, %v6314_v51  ;;  %v3445_v34 = vld [vmem:[#allocation2 + $0x52] sm:$0xff] }
  0xeb   : > { %5013 = vmatprep.mubr.msk.f32.mxu1 %vm171_vm0, %v6984_v60 }
  0xec   : > { %v6208_v2 = vpop.f32.mrf.mxu1 }
  0xed   : > { %v6217_v33 = vpop.f32.mrf.mxu0  ;;  %5078 = vmatmul.mubr.msk.f32.gmra.mxu0 %vm171_vm0, %v2673_v28  ;;  %v3444_v28 = vld [vmem:[#allocation2 + $0x4a] sm:$0xff] }
  0xee   : > { %v6213_v29 = vpop.f32.mrf.mxu1  ;;  %5014 = vmatmul.mubr.msk.f32.gmra.mxu1 %vm171_vm0, %v6985_v19  ;;  %5080 = vmatprep.mubr.msk.f32.mxu0 %vm171_vm0, %v2674_v41  ;;  %v651_v19 = vadd.f32 %v6314_v51, %v6211_v38  ;;  %v3446_v38 = vld [vmem:[#allocation2 + $0x62] sm:$0xff] }
  0xef   : > { %5016 = vmatprep.mubr.msk.f32.mxu1 %vm171_vm0, %v6986_v35  ;;  %v6225_v48 = vpop.f32.mrf.mxu0 }
  0xf0   : > { %v6222_v36 = vpop.f32.mrf.mxu1 }
  0xf1   : > { %v6231_v16 = vpop.f32.mrf.mxu0  ;;  %5081 = vmatmul.mubr.msk.f32.gmra.mxu0 %vm171_vm0, %v2675_v45 }
  0xf2   : > { %v6227_v57 = vpop.f32.mrf.mxu1  ;;  %5017 = vmatmul.mubr.msk.f32.gmra.mxu1 %vm171_vm0, %v6987_v10  ;;  %5083 = vmatprep.mubr.msk.f32.mxu0 %vm171_vm0, %v2676_v54  ;;  %v3051_v54 = vld [vmem:[#allocation2 + $0x51] sm:$0xff] }
  0xf3   : > { %5019 = vmatprep.mubr.msk.f32.mxu1 %vm171_vm0, %v6988_v30  ;;  %v6239_v59 = vpop.f32.mrf.mxu0  ;;  %v3052_v30 = vld [vmem:[#allocation2 + $0x61] sm:$0xff] }
  0xf4   : > { %v6236_v39 = vpop.f32.mrf.mxu1 }
  0xf5   : > { %v6245_v46 = vpop.f32.mrf.mxu0  ;;  %5084 = vmatmul.mubr.msk.f32.gmra.mxu0 %vm171_vm0, %v2677_v56  ;;  %v654_v56 = vadd.f32 %v6217_v33, %v6314_v51  ;;  %v3053_v33 = vld [vmem:[#allocation2 + $0x69] sm:$0xff] }
  0xf6   : > { %v6241_v1 = vpop.f32.mrf.mxu1  ;;  %5020 = vmatmul.mubr.msk.f32.gmra.mxu1 %vm171_vm0, %v6989_v5  ;;  %5086 = vmatprep.mubr.msk.f32.mxu0 %vm171_vm0, %v2678_v63 }
  0xf7   : > { %5022 = vmatprep.mubr.msk.f32.mxu1 %vm171_vm0, %v6990_v52  ;;  %v6253_v58 = vpop.f32.mrf.mxu0 }
  0xf8   : > { %v6250_v7 = vpop.f32.mrf.mxu1 }
  0xf9   : > { %v6259_v17 = vpop.f32.mrf.mxu0  ;;  %5087 = vmatmul.mubr.msk.f32.gmra.mxu0 %vm171_vm0, %v2679_v11 }
  0xfa   : > { %v6255_v13 = vpop.f32.mrf.mxu1  ;;  %5023 = vmatmul.mubr.msk.f32.gmra.mxu1 %vm171_vm0, %v6991_v0  ;;  %5089 = vmatprep.mubr.msk.f32.mxu0 %vm171_vm0, %v2680_v61  ;;  %v653_v61 = vadd.f32 %v6314_v51, %v6225_v48 }
  0xfb   : > { %5025 = vmatprep.mubr.msk.f32.mxu1 %vm171_vm0, %v6992_v3  ;;  %v6267_v40 = vpop.f32.mrf.mxu0 }
  0xfc   : > { %v6264_v31 = vpop.f32.mrf.mxu1 }
  0xfd   : > { %v6273_v50 = vpop.f32.mrf.mxu0  ;;  %5090 = vmatmul.mubr.msk.f32.gmra.mxu0 %vm171_vm0, %v2681_v6 }
  0xfe   : > { %v6269_v9 = vpop.f32.mrf.mxu1  ;;  %5026 = vmatmul.mubr.msk.f32.gmra.mxu1 %vm171_vm0, %v5886_v47  ;;  %5092 = vmatprep.mubr.msk.f32.mxu0 %vm171_vm0, %v6074_v32  ;;  %v6994_v47 = vld [vmem:[#allocation32_spill] sm:$0xff] }
  0xff   : > { %5028 = vmatprep.mubr.msk.f32.mxu1 %vm171_vm0, %v6993_v12  ;;  %v6284_v15 = vpop.f32.mrf.mxu0 }
 0x100   : > { %v6278_v55 = vpop.f32.mrf.mxu1 }
 0x101   : > { %v6290_v20 = vpop.f32.mrf.mxu0  ;;  %5093 = vmatmul.mubr.msk.f32.gmra.mxu0 %vm171_vm0, %v6084_v43 }
 0x102   : > { %v6286_v18 = vpop.f32.mrf.mxu1  ;;  %5029 = vmatmul.mubr.msk.f32.gmra.mxu1 %vm171_vm0, %v6994_v47  ;;  %5095 = vmatprep.mubr.msk.f32.mxu0 %vm171_vm0, %v2684_v14  ;;  %v3447_v14 = vld [vmem:[#allocation2 + $0x6a] sm:$0xff]  ;;  %v3054_v47 = vld [vmem:[#allocation2 + $0x79] sm:$0xff] }
 0x103   : > { %5031 = vmatprep.mubr.msk.f32.mxu1 %vm171_vm0, %v6282_v62  ;;  %v6301_v26 = vpop.f32.mrf.mxu0 }
 0x104   : > { %v6298_v32 = vpop.f32.mrf.mxu1 }
 0x105   : > { %v6307_v43 = vpop.f32.mrf.mxu0  ;;  %5096 = vmatmul.mubr.msk.f32.gmra.mxu0 %vm171_vm0, %v2685_v25  ;;  %v656_v25 = vadd.f32 %v6231_v16, %v6314_v51  ;;  %v3055_v16 = vld [vmem:[#allocation2 + $0x81] sm:$0xff] }
 0x106   : > { %v6303_v42 = vpop.f32.mrf.mxu1  ;;  %5032 = vmatmul.mubr.msk.f32.gmra.mxu1 %vm171_vm0, %v6296_v24  ;;  %5178 = vmatprep.mubr.msk.f32.mxu0 %vm171_vm0, %v3442_v27 }
 0x107   : > { %5114 = vmatprep.mubr.msk.f32.mxu1 %vm171_vm0, %v3048_v21  ;;  %v6321_v60 = vpop.f32.mrf.mxu0 }
 0x108   : > { %v6316_v53 = vpop.f32.mrf.mxu1 }
 0x109   : > { %v4796_v45 = vpop.f32.mrf.mxu0  ;;  %5179 = vmatmul.mubr.msk.f32.vlgmr.msra.gmra.mxu0 %vm171_vm0, %v3443_v4 }
 0x10a   : > { %v4732_v41 = vpop.f32.mrf.mxu1  ;;  %5115 = vmatmul.mubr.msk.f32.vlgmr.msra.gmra.mxu1 %vm171_vm0, %v3049_v44  ;;  %5181 = vmatprep.mubr.msk.f32.mxu0 %vm171_vm0, %v3444_v28  ;;  %v3448_v44 = vld [vmem:[#allocation2 + $0x7a] sm:$0xff] }
 0x10b   : > { %v1046_v35 = vadd.f32 %v4732_v41, %v652_v23  ;;  %5117 = vmatprep.mubr.msk.f32.mxu1 %vm171_vm0, %v3050_v8  ;;  %v1280_v52 = vpop.f32.mrf.mxu0  ;;  %v655_v8 = vadd.f32 %v6314_v51, %v6239_v59 }
 0x10c   : > { %v886_v10 = vpop.f32.mrf.mxu1 }
 0x10d   : > { %v6331_v63 = vadd.f32 %v4796_v45, %v1046_v35  ;;  %v1045_v5 = vadd.f32 %v886_v10, %v651_v19  ;;  %v4799_v6 = vpop.f32.mrf.mxu0  ;;  %5182 = vmatmul.mubr.msk.f32.gmra.mxu0 %vm171_vm0, %v3445_v34  ;;  %v3449_v35 = vld [vmem:[#allocation2 + $0x82] sm:$0xff]  ;;  %v3056_v45 = vld [vmem:[#allocation2 + $0x91] sm:$0xff] }
 0x10e   : > { %v4735_v11 = vpop.f32.mrf.mxu1  ;;  %5118 = vmatmul.mubr.msk.f32.gmra.mxu1 %vm171_vm0, %v3051_v54  ;;  %5184 = vmatprep.mubr.msk.f32.mxu0 %vm171_vm0, %v3446_v38  ;;  %v658_v54 = vadd.f32 %v6245_v46, %v6314_v51  ;;  %v3057_v46 = vld [vmem:[#allocation2 + $0x99] sm:$0xff] }
 0x10f   : > { %v6336_v0 = vadd.f32 %v1280_v52, %v1045_v5  ;;  %v1048_v3 = vadd.f32 %v4735_v11, %v654_v56  ;;  %5120 = vmatprep.mubr.msk.f32.mxu1 %vm171_vm0, %v3052_v30  ;;  %v1290_v27 = vpop.f32.mrf.mxu0  ;;  %v3450_v30 = vld [vmem:[#allocation2 + $0x92] sm:$0xff]  ;;  %v657_v5 = vadd.f32 %v6314_v51, %v6253_v58 }
 0x110   : > { %v896_v12 = vpop.f32.mrf.mxu1 }
 0x111   : > { %v6343_v21 = vadd.f32 %v4799_v6, %v1048_v3  ;;  %v1047_v48 = vadd.f32 %v896_v12, %v653_v61  ;;  %v4802_v41 = vpop.f32.mrf.mxu0  ;;  %5185 = vmatmul.mubr.msk.f32.gmra.mxu0 %vm171_vm0, %v3447_v14  ;;  %v3451_v3 = vld [vmem:[#allocation2 + $0x9a] sm:$0xff]  ;;  %v3058_v6 = vld [vmem:[#allocation2 + $0xa9] sm:$0xff] }
 0x112   : > { %v4738_v4 = vpop.f32.mrf.mxu1  ;;  %5121 = vmatmul.mubr.msk.f32.gmra.mxu1 %vm171_vm0, %v3053_v33  ;;  %5187 = vmatprep.mubr.msk.f32.mxu0 %vm171_vm0, %v3448_v44  ;;  %v660_v33 = vadd.f32 %v6259_v17, %v6314_v51  ;;  %v3059_v17 = vld [vmem:[#allocation2 + $0xb1] sm:$0xff] }
 0x113   : > { %v6348_v23 = vadd.f32 %v1290_v27, %v1047_v48  ;;  %v1050_v28 = vadd.f32 %v4738_v4, %v656_v25  ;;  %5123 = vmatprep.mubr.msk.f32.mxu1 %vm171_vm0, %v3054_v47  ;;  %v1300_v34 = vpop.f32.mrf.mxu0  ;;  %v3452_v47 = vld [vmem:[#allocation2 + $0xaa] sm:$0xff]  ;;  %v659_v48 = vadd.f32 %v6314_v51, %v6267_v40 }
 0x114   : > { %v906_v19 = vpop.f32.mrf.mxu1 }
 0x115   : > { %v6355_v10 = vadd.f32 %v4802_v41, %v1050_v28  ;;  %v1049_v59 = vadd.f32 %v906_v19, %v655_v8  ;;  %v4805_v11 = vpop.f32.mrf.mxu0  ;;  %5188 = vmatmul.mubr.msk.f32.gmra.mxu0 %vm171_vm0, %v3449_v35  ;;  %v3453_v28 = vld [vmem:[#allocation2 + $0xb2] sm:$0xff]  ;;  %v3060_v41 = vld [vmem:[#allocation2 + $0xc1] sm:$0xff] }
 0x116   : > { %v4741_v56 = vpop.f32.mrf.mxu1  ;;  %5124 = vmatmul.mubr.msk.f32.gmra.mxu1 %vm171_vm0, %v3055_v16  ;;  %5190 = vmatprep.mubr.msk.f32.mxu0 %vm171_vm0, %v3450_v30  ;;  %v662_v16 = vadd.f32 %v6273_v50, %v6314_v51  ;;  %v3061_v50 = vld [vmem:[#allocation2 + $0xc9] sm:$0xff] }
 0x117   : > { %v6360_v52 = vadd.f32 %v1300_v34, %v1049_v59  ;;  %v1052_v38 = vadd.f32 %v4741_v56, %v658_v54  ;;  %5126 = vmatprep.mubr.msk.f32.mxu1 %vm171_vm0, %v3056_v45  ;;  %v1310_v14 = vpop.f32.mrf.mxu0  ;;  %v3454_v45 = vld [vmem:[#allocation2 + $0xc2] sm:$0xff]  ;;  %v661_v59 = vadd.f32 %v6314_v51, %v6284_v15 }
 0x118   : > { %v916_v61 = vpop.f32.mrf.mxu1 }
 0x119   : > { %v6367_v12 = vadd.f32 %v4805_v11, %v1052_v38  ;;  %v1051_v58 = vadd.f32 %v916_v61, %v657_v5  ;;  %v4808_v4 = vpop.f32.mrf.mxu0  ;;  %5191 = vmatmul.mubr.msk.f32.gmra.mxu0 %vm171_vm0, %v3451_v3  ;;  %v3455_v38 = vld [vmem:[#allocation2 + $0xca] sm:$0xff]  ;;  %v3062_v11 = vld [vmem:[#allocation2 + $0xd9] sm:$0xff] }
 0x11a   : > { %v4744_v25 = vpop.f32.mrf.mxu1  ;;  %5127 = vmatmul.mubr.msk.f32.gmra.mxu1 %vm171_vm0, %v3057_v46  ;;  %5193 = vmatprep.mubr.msk.f32.mxu0 %vm171_vm0, %v3452_v47  ;;  %v664_v46 = vadd.f32 %v6290_v20, %v6314_v51  ;;  %v3063_v20 = vld [vmem:[#allocation2 + $0xe1] sm:$0xff] }
 0x11b   : > { %v6372_v27 = vadd.f32 %v1310_v14, %v1051_v58  ;;  %v1054_v44 = vadd.f32 %v4744_v25, %v660_v33  ;;  %5129 = vmatprep.mubr.msk.f32.mxu1 %vm171_vm0, %v3058_v6  ;;  %v1320_v35 = vpop.f32.mrf.mxu0  ;;  %v3456_v6 = vld [vmem:[#allocation2 + $0xda] sm:$0xff]  ;;  %v663_v58 = vadd.f32 %v6314_v51, %v6301_v26 }
 0x11c   : > { %v926_v8 = vpop.f32.mrf.mxu1 }
 0x11d   : > { %v6379_v19 = vadd.f32 %v4808_v4, %v1054_v44  ;;  %v1053_v40 = vadd.f32 %v926_v8, %v659_v48  ;;  %v4811_v56 = vpop.f32.mrf.mxu0  ;;  %5194 = vmatmul.mubr.msk.f32.gmra.mxu0 %vm171_vm0, %v3453_v28  ;;  %v3457_v44 = vld [vmem:[#allocation2 + $0xe2] sm:$0xff]  ;;  %v3064_v4 = vld [vmem:[#allocation2 + $0xf1] sm:$0xff] }
 0x11e   : > { %v4747_v54 = vpop.f32.mrf.mxu1  ;;  %5130 = vmatmul.mubr.msk.f32.gmra.mxu1 %vm171_vm0, %v3059_v17  ;;  %5196 = vmatprep.mubr.msk.f32.mxu0 %vm171_vm0, %v3454_v45  ;;  %v666_v17 = vadd.f32 %v6307_v43, %v6314_v51  ;;  %v3065_v43 = vld [vmem:[#allocation2 + $0xf9] sm:$0xff] }
 0x11f   : > { %v6384_v34 = vadd.f32 %v1320_v35, %v1053_v40  ;;  %v1056_v30 = vadd.f32 %v4747_v54, %v662_v16  ;;  %5132 = vmatprep.mubr.msk.f32.mxu1 %vm171_vm0, %v3060_v41  ;;  %v1330_v3 = vpop.f32.mrf.mxu0  ;;  %v3458_v41 = vld [vmem:[#allocation2 + $0xf2] sm:$0xff]  ;;  %v665_v40 = vadd.f32 %v6314_v51, %v6321_v60 }
 0x120   : > { %v936_v5 = vpop.f32.mrf.mxu1 }
 0x121   : > { %v6391_v61 = vadd.f32 %v4811_v56, %v1056_v30  ;;  %v1055_v15 = vadd.f32 %v936_v5, %v661_v59  ;;  %v4814_v25 = vpop.f32.mrf.mxu0  ;;  %5197 = vmatmul.mubr.msk.f32.gmra.mxu0 %vm171_vm0, %v3455_v38  ;;  %v3459_v30 = vld [vmem:[#allocation2 + $0xfa] sm:$0xff]  ;;  %v3066_v56 = vld [vmem:[#allocation2 + $0x109] sm:$0xff] }
 0x122   : > { %v4750_v33 = vpop.f32.mrf.mxu1  ;;  %5133 = vmatmul.mubr.msk.f32.gmra.mxu1 %vm171_vm0, %v3061_v50  ;;  %5199 = vmatprep.mubr.msk.f32.mxu0 %vm171_vm0, %v3456_v6  ;;  %v668_v50 = vadd.f32 %v6199_v22, %v6314_v51  ;;  %v3067_v22 = vld [vmem:[#allocation2 + $0x111] sm:$0xff] }
 0x123   : > { %v6396_v14 = vadd.f32 %v1330_v3, %v1055_v15  ;;  %v1058_v47 = vadd.f32 %v4750_v33, %v664_v46  ;;  %5135 = vmatprep.mubr.msk.f32.mxu1 %vm171_vm0, %v3062_v11  ;;  %v1340_v28 = vpop.f32.mrf.mxu0  ;;  %v3460_v11 = vld [vmem:[#allocation2 + $0x10a] sm:$0xff]  ;;  %v667_v15 = vadd.f32 %v6314_v51, %v6208_v2 }
 0x124   : > { %v946_v48 = vpop.f32.mrf.mxu1 }
 0x125   : > { %v6403_v8 = vadd.f32 %v4814_v25, %v1058_v47  ;;  %v1057_v26 = vadd.f32 %v946_v48, %v663_v58  ;;  %v4817_v54 = vpop.f32.mrf.mxu0  ;;  %5200 = vmatmul.mubr.msk.f32.gmra.mxu0 %vm171_vm0, %v3457_v44  ;;  %v3461_v47 = vld [vmem:[#allocation2 + $0x112] sm:$0xff]  ;;  %v3068_v25 = vld [vmem:[#allocation2 + $0x121] sm:$0xff] }
 0x126   : > { %v4753_v16 = vpop.f32.mrf.mxu1  ;;  %5136 = vmatmul.mubr.msk.f32.gmra.mxu1 %vm171_vm0, %v3063_v20  ;;  %5202 = vmatprep.mubr.msk.f32.mxu0 %vm171_vm0, %v3458_v41  ;;  %v670_v20 = vadd.f32 %v6213_v29, %v6314_v51  ;;  %v3069_v29 = vld [vmem:[#allocation2 + $0x129] sm:$0xff] }
 0x127   : > { %v6408_v35 = vadd.f32 %v1340_v28, %v1057_v26  ;;  %v1060_v45 = vadd.f32 %v4753_v16, %v666_v17  ;;  %5138 = vmatprep.mubr.msk.f32.mxu1 %vm171_vm0, %v3064_v4  ;;  %v1350_v38 = vpop.f32.mrf.mxu0  ;;  %v3462_v4 = vld [vmem:[#allocation2 + $0x122] sm:$0xff]  ;;  %v669_v26 = vadd.f32 %v6314_v51, %v6222_v36 }
 0x128   : > { %v956_v59 = vpop.f32.mrf.mxu1 }
 0x129   : > { %v6415_v5 = vadd.f32 %v4817_v54, %v1060_v45  ;;  %v1059_v60 = vadd.f32 %v956_v59, %v665_v40  ;;  %v4820_v33 = vpop.f32.mrf.mxu0  ;;  %5203 = vmatmul.mubr.msk.f32.gmra.mxu0 %vm171_vm0, %v3459_v30  ;;  %v3463_v45 = vld [vmem:[#allocation2 + $0x12a] sm:$0xff]  ;;  %v3070_v54 = vld [vmem:[#allocation2 + $0x139] sm:$0xff] }
 0x12a   : > { %v4756_v46 = vpop.f32.mrf.mxu1  ;;  %5139 = vmatmul.mubr.msk.f32.gmra.mxu1 %vm171_vm0, %v3065_v43  ;;  %5205 = vmatprep.mubr.msk.f32.mxu0 %vm171_vm0, %v3460_v11  ;;  %v672_v43 = vadd.f32 %v6227_v57, %v6314_v51  ;;  %v3071_v57 = vld [vmem:[#allocation2 + $0x141] sm:$0xff] }
 0x12b   : > { %v6420_v3 = vadd.f32 %v1350_v38, %v1059_v60  ;;  %v1062_v6 = vadd.f32 %v4756_v46, %v668_v50  ;;  %5141 = vmatprep.mubr.msk.f32.mxu1 %vm171_vm0, %v3066_v56  ;;  %v1360_v44 = vpop.f32.mrf.mxu0  ;;  %v3464_v56 = vld [vmem:[#allocation2 + $0x13a] sm:$0xff]  ;;  %v671_v60 = vadd.f32 %v6314_v51, %v6236_v39 }
 0x12c   : > { %v966_v58 = vpop.f32.mrf.mxu1 }
 0x12d   : > { %v6427_v48 = vadd.f32 %v4820_v33, %v1062_v6  ;;  %v1061_v2 = vadd.f32 %v966_v58, %v667_v15  ;;  %v4823_v16 = vpop.f32.mrf.mxu0  ;;  %5206 = vmatmul.mubr.msk.f32.gmra.mxu0 %vm171_vm0, %v3461_v47  ;;  %v3465_v6 = vld [vmem:[#allocation2 + $0x142] sm:$0xff]  ;;  %v3072_v33 = vld [vmem:[#allocation2 + $0x151] sm:$0xff] }
 0x12e   : > { %v4759_v17 = vpop.f32.mrf.mxu1  ;;  %5142 = vmatmul.mubr.msk.f32.gmra.mxu1 %vm171_vm0, %v3067_v22  ;;  %5208 = vmatprep.mubr.msk.f32.mxu0 %vm171_vm0, %v3462_v4  ;;  %v674_v22 = vadd.f32 %v6241_v1, %v6314_v51  ;;  %v3073_v1 = vld [vmem:[#allocation2 + $0x159] sm:$0xff] }
 0x12f   : > { %v6432_v28 = vadd.f32 %v1360_v44, %v1061_v2  ;;  %v1064_v41 = vadd.f32 %v4759_v17, %v670_v20  ;;  %5144 = vmatprep.mubr.msk.f32.mxu1 %vm171_vm0, %v3068_v25  ;;  %v1370_v30 = vpop.f32.mrf.mxu0  ;;  %v3466_v25 = vld [vmem:[#allocation2 + $0x152] sm:$0xff]  ;;  %v673_v2 = vadd.f32 %v6314_v51, %v6250_v7 }
 0x130   : > { %v976_v40 = vpop.f32.mrf.mxu1 }
 0x131   : > { %v6439_v59 = vadd.f32 %v4823_v16, %v1064_v41  ;;  %v1063_v36 = vadd.f32 %v976_v40, %v669_v26  ;;  %v4826_v46 = vpop.f32.mrf.mxu0  ;;  %5209 = vmatmul.mubr.msk.f32.gmra.mxu0 %vm171_vm0, %v3463_v45  ;;  %v3467_v41 = vld [vmem:[#allocation2 + $0x15a] sm:$0xff]  ;;  %v3074_v16 = vld [vmem:[#allocation2 + $0x169] sm:$0xff] }
 0x132   : > { %v4762_v50 = vpop.f32.mrf.mxu1  ;;  %5145 = vmatmul.mubr.msk.f32.gmra.mxu1 %vm171_vm0, %v3069_v29  ;;  %5211 = vmatprep.mubr.msk.f32.mxu0 %vm171_vm0, %v3464_v56  ;;  %v676_v29 = vadd.f32 %v6255_v13, %v6314_v51  ;;  %v3075_v13 = vld [vmem:[#allocation2 + $0x171] sm:$0xff] }
 0x133   : > { %v6444_v38 = vadd.f32 %v1370_v30, %v1063_v36  ;;  %v1066_v11 = vadd.f32 %v4762_v50, %v672_v43  ;;  %5147 = vmatprep.mubr.msk.f32.mxu1 %vm171_vm0, %v3070_v54  ;;  %v1380_v47 = vpop.f32.mrf.mxu0  ;;  %v3468_v54 = vld [vmem:[#allocation2 + $0x16a] sm:$0xff]  ;;  %v675_v36 = vadd.f32 %v6314_v51, %v6264_v31 }
 0x134   : > { %v986_v15 = vpop.f32.mrf.mxu1 }
 0x135   : > { %v6451_v58 = vadd.f32 %v4826_v46, %v1066_v11  ;;  %v1065_v39 = vadd.f32 %v986_v15, %v671_v60  ;;  %v4829_v17 = vpop.f32.mrf.mxu0  ;;  %5212 = vmatmul.mubr.msk.f32.gmra.mxu0 %vm171_vm0, %v3465_v6  ;;  %v3469_v11 = vld [vmem:[#allocation2 + $0x172] sm:$0xff]  ;;  %v678_v46 = vadd.f32 %v6269_v9, %v6314_v51 }
 0x136   : > { %v4765_v20 = vpop.f32.mrf.mxu1  ;;  %5148 = vmatmul.mubr.msk.f32.gmra.mxu1 %vm171_vm0, %v3071_v57  ;;  %5214 = vmatprep.mubr.msk.f32.mxu0 %vm171_vm0, %v3466_v25  ;;  %v3078_v25 = vld [vmem:[#allocation2 + $0x199] sm:$0xff] }
 0x137   : > { %v6456_v44 = vadd.f32 %v1380_v47, %v1065_v39  ;;  %v1068_v4 = vadd.f32 %v4765_v20, %v674_v22  ;;  %5150 = vmatprep.mubr.msk.f32.mxu1 %vm171_vm0, %v3072_v33  ;;  %v1390_v45 = vpop.f32.mrf.mxu0  ;;  %v677_v33 = vadd.f32 %v6314_v51, %v6278_v55  ;;  %v680_v20 = vadd.f32 %v6286_v18, %v6314_v51  ;;  %v3079_v18 = vld [vmem:[#allocation2 + $0x1a1] sm:$0xff] }
 0x138   : > { %v996_v26 = vpop.f32.mrf.mxu1 }
 0x139   : > { %v6463_v40 = vadd.f32 %v4829_v17, %v1068_v4  ;;  %v1067_v7 = vadd.f32 %v996_v26, %v673_v2  ;;  %v4832_v50 = vpop.f32.mrf.mxu0  ;;  %5215 = vmatmul.mubr.msk.f32.gmra.mxu0 %vm171_vm0, %v3467_v41  ;;  %v3472_v17 = vld [vmem:[#allocation2 + $0x19a] sm:$0xff] }
 0x13a   : > { %v4768_v43 = vpop.f32.mrf.mxu1  ;;  %5151 = vmatmul.mubr.msk.f32.gmra.mxu1 %vm171_vm0, %v3073_v1  ;;  %5217 = vmatprep.mubr.msk.f32.mxu0 %vm171_vm0, %v3468_v54 }
 0x13b   : > { %v6468_v30 = vadd.f32 %v1390_v45, %v1067_v7  ;;  %v1070_v56 = vadd.f32 %v4768_v43, %v676_v29  ;;  %5153 = vmatprep.mubr.msk.f32.mxu1 %vm171_vm0, %v3074_v16  ;;  %v1400_v31 = vpop.f32.mrf.mxu0  ;;  %v3473_v29 = vld [vmem:[#allocation2 + $0x1a2] sm:$0xff] }
 0x13c   : > { %v1006_v60 = vpop.f32.mrf.mxu1 }
 0x13d   : > { %v6475_v57 = vadd.f32 %v4832_v50, %v1070_v56  ;;  %v1069_v15 = vadd.f32 %v1006_v60, %v675_v36  ;;  %v4835_v47 = vpop.f32.mrf.mxu0  ;;  %5218 = vmatmul.mubr.msk.f32.gmra.mxu0 %vm171_vm0, %v3469_v11 }
 0x13e   : > { %v4771_v6 = vpop.f32.mrf.mxu1  ;;  %5154 = vmatmul.mubr.msk.f32.gmra.mxu1 %vm171_vm0, %v3075_v13  ;;  %5220 = vmatprep.mubr.msk.f32.mxu0 %vm171_vm0, %v6282_v62 }
 0x13f   : > { %v6480_v22 = vadd.f32 %v1400_v31, %v1069_v15  ;;  %v1072_v39 = vadd.f32 %v4771_v6, %v678_v46  ;;  %5156 = vmatprep.mubr.msk.f32.mxu1 %vm171_vm0, %v6076_v37  ;;  %v1410_v4 = vpop.f32.mrf.mxu0  ;;  %v679_v37 = vadd.f32 %v6314_v51, %v6298_v32 }
 0x140   : > { %v1016_v9 = vpop.f32.mrf.mxu1 }
 0x141   : > { %v6489_v2 = vadd.f32 %v4835_v47, %v1072_v39  ;;  %v1071_v55 = vadd.f32 %v1016_v9, %v677_v33  ;;  %v4838_v62 = vpop.f32.mrf.mxu0  ;;  %5221 = vmatmul.mubr.msk.f32.gmra.mxu0 %vm171_vm0, %v6296_v24  ;;  %v681_v24 = vadd.f32 %v6314_v51, %v6316_v53 }
 0x142   : > { %v4774_v1 = vpop.f32.mrf.mxu1  ;;  %5157 = vmatmul.mubr.msk.f32.gmra.mxu1 %vm171_vm0, %v6088_v49  ;;  %5223 = vmatprep.mubr.msk.f32.mxu0 %vm171_vm0, %v3472_v17  ;;  %v682_v49 = vadd.f32 %v6303_v42, %v6314_v51 }
 0x143   : > { %v6495_v26 = vadd.f32 %v1410_v4, %v1071_v55  ;;  %v1074_v41 = vadd.f32 %v4774_v1, %v680_v20  ;;  %5159 = vmatprep.mubr.msk.f32.mxu1 %vm171_vm0, %v3078_v25  ;;  %v1420_v45 = vpop.f32.mrf.mxu0 }
 0x144   : > { %v1026_v16 = vpop.f32.mrf.mxu1 }
 0x145   : > { %v6503_v7 = vadd.f32 %v4838_v62, %v1074_v41  ;;  %v1073_v32 = vadd.f32 %v1026_v16, %v679_v37  ;;  %v4841_v56 = vpop.f32.mrf.mxu0  ;;  %5224 = vmatmul.mubr.msk.f32.gmra.mxu0 %vm171_vm0, %v3473_v29 }
 0x146   : > { %v4777_v54 = vpop.f32.mrf.mxu1  ;;  %5160 = vmatmul.mubr.msk.f32.gmra.mxu1 %vm171_vm0, %v3079_v18 }
 0x147   : > { %v6508_v43 = vadd.f32 %v1420_v45, %v1073_v32  ;;  %v1076_v36 = vadd.f32 %v4777_v54, %v682_v49  ;;  %v1430_v60 = vpop.f32.mrf.mxu0 }
 0x148   : > { %v1036_v50 = vpop.f32.mrf.mxu1 }
 0x149   : > { %v6511_v13 = vadd.f32 %v4841_v56, %v1076_v36  ;;  %v1075_v42 = vadd.f32 %v1036_v50, %v681_v24  ;;  %v4924_v31 = vpop.f32.mrf.mxu0 }
 0x14a   : > { %v4860_v11 = vpop.f32.mrf.mxu1 }
 0x14b   : > { %v6513_v46 = vadd.f32 %v1430_v60, %v1075_v42  ;;  %v1834_v15 = vadd.f32 %v4860_v11, %v6331_v63  ;;  %v2068_v53 = vpop.f32.mrf.mxu0 }
 0x14c   : > { %v1674_v6 = vpop.f32.mrf.mxu1 }
 0x14d   : > { %v6516_v33 = vadd.f32 %v4924_v31, %v1834_v15  ;;  %v1833_v51 = vadd.f32 %v1674_v6, %v6336_v0  ;;  %v4927_v25 = vpop.f32.mrf.mxu0 }
 0x14e   : > { %v4863_v39 = vpop.f32.mrf.mxu1 }
 0x14f   : > { %v6519_v47 = vadd.f32 %v2068_v53, %v1833_v51  ;;  %v1836_v9 = vadd.f32 %v4863_v39, %v6343_v21  ;;  %v2078_v17 = vpop.f32.mrf.mxu0 }
 0x150   : > { %v1684_v20 = vpop.f32.mrf.mxu1 }
 0x151   : > { %v6522_v55 = vadd.f32 %v4927_v25, %v1836_v9  ;;  %v1835_v4 = vadd.f32 %v1684_v20, %v6348_v23  ;;  %v4930_v41 = vpop.f32.mrf.mxu0 }
 0x152   : > { %v4866_v63 = vpop.f32.mrf.mxu1 }
 0x153   : > { %v6525_v1 = vadd.f32 %v2078_v17, %v1835_v4  ;;  %v1838_v37 = vadd.f32 %v4866_v63, %v6355_v10  ;;  %v2088_v16 = vpop.f32.mrf.mxu0 }
 0x154   : > { %v1694_v0 = vpop.f32.mrf.mxu1 }
 0x155   : > { %v6528_v62 = vadd.f32 %v4930_v41, %v1838_v37  ;;  %v1837_v18 = vadd.f32 %v1694_v0, %v6360_v52  ;;  %v4933_v32 = vpop.f32.mrf.mxu0 }
 0x156   : > { %v4869_v21 = vpop.f32.mrf.mxu1 }
 0x157   : > { %v6531_v29 = vadd.f32 %v2088_v16, %v1837_v18  ;;  %v1840_v49 = vadd.f32 %v4869_v21, %v6367_v12  ;;  %v2098_v24 = vpop.f32.mrf.mxu0 }
 0x158   : > { %v1704_v23 = vpop.f32.mrf.mxu1 }
 0x159   : > { %v6534_v45 = vadd.f32 %v4933_v32, %v1840_v49  ;;  %v1839_v54 = vadd.f32 %v1704_v23, %v6372_v27  ;;  %v4936_v50 = vpop.f32.mrf.mxu0 }
 0x15a   : > { %v4872_v10 = vpop.f32.mrf.mxu1 }
 0x15b   : > { %v6537_v36 = vadd.f32 %v2098_v24, %v1839_v54  ;;  %v1842_v56 = vadd.f32 %v4872_v10, %v6379_v19  ;;  %v2108_v11 = vpop.f32.mrf.mxu0 }
 0x15c   : > { %v1714_v52 = vpop.f32.mrf.mxu1 }
 0x15d   : > { %v6540_v42 = vadd.f32 %v4936_v50, %v1842_v56  ;;  %v1841_v60 = vadd.f32 %v1714_v52, %v6384_v34  ;;  %v4939_v6 = vpop.f32.mrf.mxu0 }
 0x15e   : > { %v4875_v12 = vpop.f32.mrf.mxu1 }
 0x15f   : > { %v6543_v15 = vadd.f32 %v2108_v11, %v1841_v60  ;;  %v1844_v31 = vadd.f32 %v4875_v12, %v6391_v61  ;;  %v2118_v39 = vpop.f32.mrf.mxu0 }
 0x160   : > { %v1724_v27 = vpop.f32.mrf.mxu1 }
 0x161   : > { %v6546_v51 = vadd.f32 %v4939_v6, %v1844_v31  ;;  %v1843_v53 = vadd.f32 %v1724_v27, %v6396_v14  ;;  %v4942_v20 = vpop.f32.mrf.mxu0 }
 0x162   : > { %v4878_v19 = vpop.f32.mrf.mxu1 }
 0x163   : > { %v6549_v9 = vadd.f32 %v2118_v39, %v1843_v53  ;;  %v1846_v25 = vadd.f32 %v4878_v19, %v6403_v8  ;;  %v2128_v63 = vpop.f32.mrf.mxu0 }
 0x164   : > { %v1734_v34 = vpop.f32.mrf.mxu1 }
 0x165   : > { %v6552_v4 = vadd.f32 %v4942_v20, %v1846_v25  ;;  %v1845_v17 = vadd.f32 %v1734_v34, %v6408_v35  ;;  %v4945_v0 = vpop.f32.mrf.mxu0 }
 0x166   : > { %v4881_v61 = vpop.f32.mrf.mxu1 }
 0x167   : > { %v6555_v37 = vadd.f32 %v2128_v63, %v1845_v17  ;;  %v1848_v41 = vadd.f32 %v4881_v61, %v6415_v5  ;;  %v2138_v21 = vpop.f32.mrf.mxu0 }
 0x168   : > { %v1744_v14 = vpop.f32.mrf.mxu1 }
 0x169   : > { %v6558_v18 = vadd.f32 %v4945_v0, %v1848_v41  ;;  %v1847_v16 = vadd.f32 %v1744_v14, %v6420_v3  ;;  %v4948_v23 = vpop.f32.mrf.mxu0 }
 0x16a   : > { %v4884_v8 = vpop.f32.mrf.mxu1 }
 0x16b   : > { %v6561_v49 = vadd.f32 %v2138_v21, %v1847_v16  ;;  %v1850_v32 = vadd.f32 %v4884_v8, %v6427_v48  ;;  %v2148_v10 = vpop.f32.mrf.mxu0 }
 0x16c   : > { %v1754_v35 = vpop.f32.mrf.mxu1 }
 0x16d   : > { %v6564_v54 = vadd.f32 %v4948_v23, %v1850_v32  ;;  %v1849_v24 = vadd.f32 %v1754_v35, %v6432_v28  ;;  %v4951_v52 = vpop.f32.mrf.mxu0 }
 0x16e   : > { %v4887_v5 = vpop.f32.mrf.mxu1 }
 0x16f   : > { %v6567_v56 = vadd.f32 %v2148_v10, %v1849_v24  ;;  %v1852_v50 = vadd.f32 %v4887_v5, %v6439_v59  ;;  %v2158_v12 = vpop.f32.mrf.mxu0 }
 0x170   : > { %v1764_v3 = vpop.f32.mrf.mxu1 }
 0x171   : > { %v6570_v60 = vadd.f32 %v4951_v52, %v1852_v50  ;;  %v1851_v11 = vadd.f32 %v1764_v3, %v6444_v38  ;;  %v4954_v27 = vpop.f32.mrf.mxu0 }
 0x172   : > { %v4890_v48 = vpop.f32.mrf.mxu1 }
 0x173   : > { %6995 = vst [vmem:[#allocation3_spill] sm:$0xff] %v6570_v60  ;;  %v6573_v31 = vadd.f32 %v2158_v12, %v1851_v11  ;;  %v1854_v6 = vadd.f32 %v4890_v48, %v6451_v58  ;;  %v2168_v19 = vpop.f32.mrf.mxu0 }
 0x174   : > { %v1774_v28 = vpop.f32.mrf.mxu1 }
 0x175   : > { %6996 = vst [vmem:[#allocation4_spill] sm:$0xff] %v6573_v31  ;;  %v6576_v53 = vadd.f32 %v4954_v27, %v1854_v6  ;;  %v1853_v39 = vadd.f32 %v1774_v28, %v6456_v44  ;;  %v4957_v34 = vpop.f32.mrf.mxu0 }
 0x176   : > { %v4893_v59 = vpop.f32.mrf.mxu1 }
 0x177   : > { %6997 = vst [vmem:[#allocation5_spill] sm:$0xff] %v6576_v53  ;;  %v6579_v25 = vadd.f32 %v2168_v19, %v1853_v39  ;;  %v1856_v20 = vadd.f32 %v4893_v59, %v6463_v40  ;;  %v2178_v61 = vpop.f32.mrf.mxu0 }
 0x178   : > { %v1784_v38 = vpop.f32.mrf.mxu1 }
 0x179   : > { %6998 = vst [vmem:[#allocation6_spill] sm:$0xff] %v6579_v25  ;;  %v6582_v17 = vadd.f32 %v4957_v34, %v1856_v20  ;;  %v1855_v63 = vadd.f32 %v1784_v38, %v6468_v30  ;;  %v4960_v14 = vpop.f32.mrf.mxu0 }
 0x17a   : > { %v4896_v58 = vpop.f32.mrf.mxu1 }
 0x17b   : > { %6999 = vst [vmem:[#allocation7_spill] sm:$0xff] %v6582_v17  ;;  %v6585_v41 = vadd.f32 %v2178_v61, %v1855_v63  ;;  %v1858_v0 = vadd.f32 %v4896_v58, %v6475_v57  ;;  %v2188_v8 = vpop.f32.mrf.mxu0 }
 0x17c   : > { %v1794_v44 = vpop.f32.mrf.mxu1 }
 0x17d   : > { %7000 = vst [vmem:[#allocation8_spill] sm:$0xff] %v6585_v41  ;;  %v6588_v16 = vadd.f32 %v4960_v14, %v1858_v0  ;;  %v1857_v21 = vadd.f32 %v1794_v44, %v6480_v22  ;;  %v4963_v35 = vpop.f32.mrf.mxu0 }
 0x17e   : > { %v4899_v40 = vpop.f32.mrf.mxu1 }
 0x17f   : > { %7001 = vst [vmem:[#allocation9_spill] sm:$0xff] %v6588_v16  ;;  %v6591_v32 = vadd.f32 %v2188_v8, %v1857_v21  ;;  %v1860_v23 = vadd.f32 %v4899_v40, %v6489_v2  ;;  %v2198_v5 = vpop.f32.mrf.mxu0 }
 0x180   : > { %v1804_v30 = vpop.f32.mrf.mxu1 }
 0x181   : > { %7002 = vst [vmem:[#allocation10_spill] sm:$0xff] %v6591_v32  ;;  %v6594_v24 = vadd.f32 %v4963_v35, %v1860_v23  ;;  %v1859_v10 = vadd.f32 %v1804_v30, %v6495_v26  ;;  %v4966_v3 = vpop.f32.mrf.mxu0 }
 0x182   : > { %v4902_v57 = vpop.f32.mrf.mxu1 }
 0x183   : > { %7003 = vst [vmem:[#allocation11_spill] sm:$0xff] %v6594_v24  ;;  %v6597_v50 = vadd.f32 %v2198_v5, %v1859_v10  ;;  %v1862_v52 = vadd.f32 %v4902_v57, %v6503_v7  ;;  %v2208_v48 = vpop.f32.mrf.mxu0 }
 0x184   : > { %v1814_v22 = vpop.f32.mrf.mxu1 }
 0x185   : > { %7004 = vst [vmem:[#allocation12_spill] sm:$0xff] %v6597_v50  ;;  %v6600_v11 = vadd.f32 %v4966_v3, %v1862_v52  ;;  %v1861_v12 = vadd.f32 %v1814_v22, %v6508_v43  ;;  %v4969_v28 = vpop.f32.mrf.mxu0 }
 0x186   : > { %v4905_v2 = vpop.f32.mrf.mxu1 }
 0x187   : > { %7005 = vst [vmem:[#allocation13_spill] sm:$0xff] %v6600_v11  ;;  %v6603_v6 = vadd.f32 %v2208_v48, %v1861_v12  ;;  %v1864_v27 = vadd.f32 %v4905_v2, %v6511_v13  ;;  %v2218_v59 = vpop.f32.mrf.mxu0 }
 0x188   : > { %v1824_v26 = vpop.f32.mrf.mxu1 }
 0x189   : > { %7006 = vst [vmem:[#allocation14_spill] sm:$0xff] %v6603_v6  ;;  %v6606_v39 = vadd.f32 %v4969_v28, %v1864_v27  ;;  %v1863_v19 = vadd.f32 %v1824_v26, %v6513_v46  ;;  %v6611_v34 = vpop.f32.mrf.mxu0 }
 0x18a   : > { %v4988_v7 = vpop.f32.mrf.mxu1 }
 0x18b   : > { %7007 = vst [vmem:[#allocation15_spill] sm:$0xff] %v6606_v39  ;;  %v6609_v20 = vadd.f32 %v2218_v59, %v1863_v19  ;;  %v6613_v43 = vpop.f32.mrf.mxu0 }
 0x18c   : > { %v2462_v38 = vpop.f32.mrf.mxu1 }
 0x18d   : > { %7008 = vst [vmem:[#allocation16_spill] sm:$0xff] %v6609_v20  ;;  %v6615_v61 = vpop.f32.mrf.mxu0 }
 0x18e   : > { %v4991_v63 = vpop.f32.mrf.mxu1 }
 0x18f   : > { %v6619_v13 = vpop.f32.mrf.mxu0 }
 0x190   : > { %v6617_v58 = vpop.f32.mrf.mxu1 }
 0x191   : > { %v6623_v14 = vpop.f32.mrf.mxu0 }
 0x192   : > { %v6621_v0 = vpop.f32.mrf.mxu1 }
 0x193   : > { %v6627_v44 = vpop.f32.mrf.mxu0 }
 0x194   : > { %v6625_v46 = vpop.f32.mrf.mxu1 }
 0x195   : > { %v6631_v8 = vpop.f32.mrf.mxu0 }
 0x196   : > { %v6629_v21 = vpop.f32.mrf.mxu1 }
 0x197   : > { %v6635_v23 = vpop.f32.mrf.mxu0 }
 0x198   : > { %v6633_v40 = vpop.f32.mrf.mxu1 }
 0x199   : > { %v6639_v30 = vpop.f32.mrf.mxu0 }
 0x19a   : > { %v6637_v35 = vpop.f32.mrf.mxu1 }
 0x19b   : > { %v6643_v5 = vpop.f32.mrf.mxu0 }
 0x19c   : > { %v6641_v10 = vpop.f32.mrf.mxu1 }
 0x19d   : > { %v6647_v52 = vpop.f32.mrf.mxu0 }
 0x19e   : > { %v6645_v57 = vpop.f32.mrf.mxu1 }
 0x19f   : > { %v6651_v22 = vpop.f32.mrf.mxu0 }
 0x1a0   : > { %v6649_v3 = vpop.f32.mrf.mxu1 }
 0x1a1   : > { %v6655_v48 = vpop.f32.mrf.mxu0 }
 0x1a2   : > { %v6653_v12 = vpop.f32.mrf.mxu1 }
 0x1a3   : > { %v6659_v27 = vpop.f32.mrf.mxu0 }
 0x1a4   : > { %v6657_v2 = vpop.f32.mrf.mxu1 }
 0x1a5   : > { %v6663_v26 = vpop.f32.mrf.mxu0 }
 0x1a6   : > { %v6661_v28 = vpop.f32.mrf.mxu1 }
 0x1a7   : > { %v6667_v59 = vpop.f32.mrf.mxu0 }
 0x1a8   : > { %v6665_v19 = vpop.f32.mrf.mxu1 }
 0x1a9   : > { %v6671_v39 = vpop.f32.mrf.mxu0 }
 0x1aa   : > { %v6669_v20 = vpop.f32.mrf.mxu1 }
 0x1ab   : > { %v6675_v11 = vpop.f32.mrf.mxu0 }
 0x1ac   : > { %v6673_v6 = vpop.f32.mrf.mxu1  ;;  %7009 = vst [vmem:[#allocation17_spill] sm:$0xff] %v6675_v11 }
 0x1ad   : > { %v6679_v24 = vpop.f32.mrf.mxu0 }
 0x1ae   : > { %v6677_v50 = vpop.f32.mrf.mxu1  ;;  %7011 = vst [vmem:[#allocation19_spill] sm:$0xff] %v6679_v24 }
 0x1af   : > { %7010 = vst [vmem:[#allocation18_spill] sm:$0xff] %v6677_v50  ;;  %v6683_v16 = vpop.f32.mrf.mxu0 }
 0x1b0   : > { %v6681_v32 = vpop.f32.mrf.mxu1  ;;  %7013 = vst [vmem:[#allocation21_spill] sm:$0xff] %v6683_v16 }
 0x1b1   : > { %7012 = vst [vmem:[#allocation20_spill] sm:$0xff] %v6681_v32  ;;  %v6687_v17 = vpop.f32.mrf.mxu0 }
 0x1b2   : > { %v6685_v41 = vpop.f32.mrf.mxu1  ;;  %7015 = vst [vmem:[#allocation23_spill] sm:$0xff] %v6687_v17 }
 0x1b3   : > { %7014 = vst [vmem:[#allocation22_spill] sm:$0xff] %v6685_v41  ;;  %v6691_v53 = vpop.f32.mrf.mxu0 }
 0x1b4   : > { %v6689_v25 = vpop.f32.mrf.mxu1  ;;  %7017 = vst [vmem:[#allocation25_spill] sm:$0xff] %v6691_v53 }
 0x1b5   : > { %7016 = vst [vmem:[#allocation24_spill] sm:$0xff] %v6689_v25  ;;  %v6695_v60 = vpop.f32.mrf.mxu0 }
 0x1b6   : > { %v6693_v31 = vpop.f32.mrf.mxu1  ;;  %7019 = vst [vmem:[#allocation27_spill] sm:$0xff] %v6695_v60 }
 0x1b7   : > { %7018 = vst [vmem:[#allocation26_spill] sm:$0xff] %v6693_v31  ;;  %v6699_v50 = vpop.f32.mrf.mxu0 }
 0x1b8   : > { %v6697_v11 = vpop.f32.mrf.mxu1  ;;  %7021 = vst [vmem:[#allocation29_spill] sm:$0xff] %v6699_v50 }
 0x1b9   : > { %7020 = vst [vmem:[#allocation28_spill] sm:$0xff] %v6697_v11  ;;  %v6703_v32 = vpop.f32.mrf.mxu0 }
 0x1ba   : > { %v6701_v24 = vpop.f32.mrf.mxu1  ;;  %7023 = vst [vmem:[#allocation31_spill] sm:$0xff] %v6703_v32  ;;  %v2622_v32 = vadd.f32 %v4988_v7, %v6516_v33  ;;  %v2623_v33 = vadd.f32 %v6617_v58, %v6525_v1 }
 0x1bb   : > { %7022 = vst [vmem:[#allocation30_spill] sm:$0xff] %v6701_v24  ;;  %v6707_v41 = vpop.f32.mrf.mxu0 }
 0x1bc   : > { %v6705_v16 = vpop.f32.mrf.mxu1  ;;  %7025 = vst [vmem:[#allocation33_spill] sm:$0xff] %v6707_v41 }
 0x1bd   : > { %7024 = vst [vmem:[#allocation32_spill] sm:$0xff] %v6705_v16  ;;  %v6711_v25 = vpop.f32.mrf.mxu0 }
 0x1be   : > { %v6709_v17 = vpop.f32.mrf.mxu1  ;;  %7027 = vst [vmem:[#allocation35_spill] sm:$0xff] %v6711_v25 }
 0x1bf   : > { %7026 = vst [vmem:[#allocation34_spill] sm:$0xff] %v6709_v17  ;;  %v6715_v31 = vpop.f32.mrf.mxu0  ;;  %v2621_v17 = vadd.f32 %v2462_v38, %v6519_v47  ;;  %v2625_v38 = vadd.f32 %v6625_v46, %v6531_v29 }
 0x1c0   : > { %v6713_v53 = vpop.f32.mrf.mxu1  ;;  %7029 = vst [vmem:[#allocation37_spill] sm:$0xff] %v6715_v31  ;;  %v3017_v31 = vadd.f32 %v6611_v34, %v2622_v32 }
 0x1c1   : > { %7028 = vst [vmem:[#allocation36_spill] sm:$0xff] %v6713_v53  ;;  %v6719_v11 = vpop.f32.mrf.mxu0  ;;  %v3020_v29 = vadd.f32 %v6627_v44, %v2625_v38 }
 0x1c2   : > { %v6717_v60 = vpop.f32.mrf.mxu1  ;;  %7031 = vst [vmem:[#allocation39_spill] sm:$0xff] %v6719_v11 }
 0x1c3   : > { %7030 = vst [vmem:[#allocation38_spill] sm:$0xff] %v6717_v60  ;;  %v6724_v16 = vpop.f32.mrf.mxu0  ;;  %v2624_v60 = vadd.f32 %v4991_v63, %v6522_v55 }
 0x1c4   : > { %v6721_v50 = vpop.f32.mrf.mxu1  ;;  %7033 = vst [vmem:[#allocation41_spill] sm:$0xff] %v6724_v16 }
 0x1c5   : > { %7032 = vst [vmem:[#allocation40_spill] sm:$0xff] %v6721_v50  ;;  %v6729_v25 = vpop.f32.mrf.mxu0  ;;  %v3016_v50 = vadd.f32 %v6613_v43, %v2621_v17  ;;  %v3019_v55 = vadd.f32 %v6615_v61, %v2624_v60  ;;  %v2626_v17 = vadd.f32 %v6621_v0, %v6528_v62  ;;  %v2628_v62 = vadd.f32 %v6629_v21, %v6534_v45 }
 0x1c6   : > { %v6726_v41 = vpop.f32.mrf.mxu1  ;;  %v2627_v0 = vadd.f32 %v6633_v40, %v6537_v36  ;;  %v2629_v40 = vadd.f32 %v6641_v10, %v6543_v15  ;;  %v2631_v10 = vadd.f32 %v6649_v3, %v6549_v9  ;;  %v2633_v3 = vadd.f32 %v6657_v2, %v6555_v37 }
 0x1c7   : > { %v6735_v11 = vpop.f32.mrf.mxu0  ;;  %v3021_v60 = vadd.f32 %v6623_v14, %v2626_v17  ;;  %v3023_v45 = vadd.f32 %v6631_v8, %v2628_v62  ;;  %v2635_v2 = vadd.f32 %v6665_v19, %v6561_v49  ;;  %v2637_v19 = vadd.f32 %v6673_v6, %v6567_v56  ;;  %v7038_v6 = vld [vmem:[#allocation4_spill] sm:$0xff] }
 0x1c8   : > { %v6731_v53 = vpop.f32.mrf.mxu1  ;;  %7034 = vst [vmem:[#allocation42_spill] sm:$0xff] %v6735_v11  ;;  %v3022_v36 = vadd.f32 %v6635_v23, %v2627_v0  ;;  %v3024_v15 = vadd.f32 %v6643_v5, %v2629_v40  ;;  %v3026_v9 = vadd.f32 %v6651_v22, %v2631_v10  ;;  %v3028_v37 = vadd.f32 %v6659_v27, %v2633_v3  ;;  %v7042_v10 = vld [vmem:[#allocation22_spill] sm:$0xff] }
 0x1c9   : > { %v5180_v16 = vpop.f32.mrf.mxu0  ;;  %v3030_v49 = vadd.f32 %v6667_v59, %v2635_v2  ;;  %v7049_v2 = vld [vmem:[#allocation25_spill] sm:$0xff] }
 0x1ca   : > { %v5116_v24 = vpop.f32.mrf.mxu1 }
 0x1cb   : > { %v3411_v7 = vadd.f32 %v5116_v24, %v3017_v31  ;;  %v3645_v1 = vpop.f32.mrf.mxu0  ;;  %v3018_v24 = vadd.f32 %v6619_v13, %v2623_v33 }
 0x1cc   : > { %v3251_v47 = vpop.f32.mrf.mxu1 }
 0x1cd   : > { %v3805_v32 = vadd.f32 %v5180_v16, %v3411_v7  ;;  %v3410_v34 = vadd.f32 %v3251_v47, %v3016_v50  ;;  %v5183_v58 = vpop.f32.mrf.mxu0 }
 0x1ce   : > { %v5119_v31 = vpop.f32.mrf.mxu1 }
 0x1cf   : > { %3838 = vst.msk [vmem:[%s6745_s24 + $0x8] sm:$0xff] %vm3836_vm3, %v3805_v32  ;;  %v3804_v43 = vadd.f32 %v3645_v1, %v3410_v34  ;;  %v3413_v63 = vadd.f32 %v5119_v31, %v3019_v55  ;;  %v3655_v61 = vpop.f32.mrf.mxu0 }
 0x1d0   : > { %v3261_v11 = vpop.f32.mrf.mxu1 }
 0x1d1   : > { %3837 = vst.msk [vmem:[%s6745_s24] sm:$0xff] %vm3836_vm3, %v3804_v43  ;;  %v3807_v16 = vadd.f32 %v5183_v58, %v3413_v63  ;;  %v3412_v50 = vadd.f32 %v3261_v11, %v3018_v24  ;;  %v5186_v33 = vpop.f32.mrf.mxu0  ;;  %v2630_v11 = vadd.f32 %v6637_v35, %v6540_v42  ;;  %v2632_v35 = vadd.f32 %v6645_v57, %v6546_v51 }
 0x1d2   : > { %v5122_v13 = vpop.f32.mrf.mxu1  ;;  %v2634_v57 = vadd.f32 %v6653_v12, %v6552_v4  ;;  %v2636_v12 = vadd.f32 %v6661_v28, %v6558_v18  ;;  %v2638_v28 = vadd.f32 %v6669_v20, %v6564_v54  ;;  %v7035_v20 = vld [vmem:[#allocation3_spill] sm:$0xff] }
 0x1d3   : > { %3840 = vst.msk [vmem:[%s6745_s24 + $0x18] sm:$0xff] %vm3836_vm3, %v3807_v16  ;;  %v3806_v46 = vadd.f32 %v3655_v61, %v3412_v50  ;;  %v3415_v14 = vadd.f32 %v5122_v13, %v3021_v60  ;;  %v3665_v47 = vpop.f32.mrf.mxu0  ;;  %v3025_v42 = vadd.f32 %v6639_v30, %v2630_v11  ;;  %v3027_v51 = vadd.f32 %v6647_v52, %v2632_v35 }
 0x1d4   : > { %v3271_v7 = vpop.f32.mrf.mxu1  ;;  %v3029_v4 = vadd.f32 %v6655_v48, %v2634_v57  ;;  %v3031_v18 = vadd.f32 %v6663_v26, %v2636_v12  ;;  %v3033_v54 = vadd.f32 %v6671_v39, %v2638_v28  ;;  %v7043_v57 = vld [vmem:[#allocation21_spill] sm:$0xff]  ;;  %v7048_v12 = vld [vmem:[#allocation26_spill] sm:$0xff] }
 0x1d5   : > { %3839 = vst.msk [vmem:[%s6745_s24 + $0x10] sm:$0xff] %vm3836_vm3, %v3806_v46  ;;  %v3809_v21 = vadd.f32 %v5186_v33, %v3415_v14  ;;  %v3414_v44 = vadd.f32 %v3271_v7, %v3020_v29  ;;  %v5189_v32 = vpop.f32.mrf.mxu0 }
 0x1d6   : > { %v5125_v55 = vpop.f32.mrf.mxu1 }
 0x1d7   : > { %3842 = vst.msk [vmem:[%s6745_s24 + $0x28] sm:$0xff] %vm3836_vm3, %v3809_v21  ;;  %v3808_v17 = vadd.f32 %v3665_v47, %v3414_v44  ;;  %v3417_v8 = vadd.f32 %v5125_v55, %v3023_v45  ;;  %v3675_v31 = vpop.f32.mrf.mxu0  ;;  %v7036_v55 = vld [vmem:[#allocation18_spill] sm:$0xff] }
 0x1d8   : > { %v3281_v34 = vpop.f32.mrf.mxu1 }
 0x1d9   : > { %3841 = vst.msk [vmem:[%s6745_s24 + $0x20] sm:$0xff] %vm3836_vm3, %v3808_v17  ;;  %v3811_v1 = vadd.f32 %v5189_v32, %v3417_v8  ;;  %v3416_v23 = vadd.f32 %v3281_v34, %v3022_v36  ;;  %v5192_v43 = vpop.f32.mrf.mxu0  ;;  %v2640_v36 = vadd.f32 %v7036_v55, %v7035_v20  ;;  %v7037_v32 = vld [vmem:[#allocation17_spill] sm:$0xff]  ;;  %v7039_v34 = vld [vmem:[#allocation20_spill] sm:$0xff] }
 0x1da   : > { %v5128_v24 = vpop.f32.mrf.mxu1  ;;  %v3032_v56 = vadd.f32 %v7037_v32, %v2637_v19  ;;  %v7054_v19 = vld [vmem:[#allocation30_spill] sm:$0xff]  ;;  %v7055_v20 = vld [vmem:[#allocation29_spill] sm:$0xff] }
 0x1db   : > { %3844 = vst.msk [vmem:[%s6745_s24 + $0x38] sm:$0xff] %vm3836_vm3, %v3811_v1  ;;  %v3810_v38 = vadd.f32 %v3675_v31, %v3416_v23  ;;  %v3419_v30 = vadd.f32 %v5128_v24, %v3025_v42  ;;  %v3685_v60 = vpop.f32.mrf.mxu0  ;;  %v2639_v42 = vadd.f32 %v7039_v34, %v7038_v6  ;;  %v7040_v31 = vld [vmem:[#allocation19_spill] sm:$0xff] }
 0x1dc   : > { %v3291_v63 = vpop.f32.mrf.mxu1  ;;  %v3035_v24 = vadd.f32 %v7040_v31, %v2640_v36  ;;  %v7056_v36 = vld [vmem:[#allocation10_spill] sm:$0xff]  ;;  %v7058_v6 = vld [vmem:[#allocation31_spill] sm:$0xff] }
 0x1dd   : > { %3843 = vst.msk [vmem:[%s6745_s24 + $0x30] sm:$0xff] %vm3836_vm3, %v3810_v38  ;;  %v3813_v58 = vadd.f32 %v5192_v43, %v3419_v30  ;;  %v3418_v5 = vadd.f32 %v3291_v63, %v3024_v15  ;;  %v5195_v50 = vpop.f32.mrf.mxu0  ;;  %v7041_v15 = vld [vmem:[#allocation5_spill] sm:$0xff] }
 0x1de   : > { %v5131_v62 = vpop.f32.mrf.mxu1  ;;  %v2642_v38 = vadd.f32 %v7042_v10, %v7041_v15  ;;  %v7061_v15 = vld [vmem:[#allocation33_spill] sm:$0xff] }
 0x1df   : > { %3846 = vst.msk [vmem:[%s6745_s24 + $0x48] sm:$0xff] %vm3836_vm3, %v3813_v58  ;;  %v3812_v16 = vadd.f32 %v3685_v60, %v3418_v5  ;;  %v3421_v52 = vadd.f32 %v5131_v62, %v3027_v51  ;;  %v3695_v29 = vpop.f32.mrf.mxu0  ;;  %v3034_v58 = vadd.f32 %v7043_v57, %v2639_v42  ;;  %v7044_v5 = vld [vmem:[#allocation6_spill] sm:$0xff]  ;;  %v7045_v60 = vld [vmem:[#allocation24_spill] sm:$0xff]  ;;  %v7059_v42 = vld [vmem:[#allocation11_spill] sm:$0xff] }
 0x1e0   : > { %v3301_v61 = vpop.f32.mrf.mxu1  ;;  %v2641_v62 = vadd.f32 %v7045_v60, %v7044_v5  ;;  %v7064_v5 = vld [vmem:[#allocation35_spill] sm:$0xff] }
 0x1e1   : > { %3845 = vst.msk [vmem:[%s6745_s24 + $0x40] sm:$0xff] %vm3836_vm3, %v3812_v16  ;;  %v3815_v13 = vadd.f32 %v5195_v50, %v3421_v52  ;;  %v3420_v22 = vadd.f32 %v3301_v61, %v3026_v9  ;;  %v5198_v14 = vpop.f32.mrf.mxu0  ;;  %v7046_v50 = vld [vmem:[#allocation23_spill] sm:$0xff] }
 0x1e2   : > { %v5134_v0 = vpop.f32.mrf.mxu1  ;;  %v3037_v61 = vadd.f32 %v7046_v50, %v2642_v38  ;;  %v7062_v38 = vld [vmem:[#allocation12_spill] sm:$0xff] }
 0x1e3   : > { %3848 = vst.msk [vmem:[%s6745_s24 + $0x58] sm:$0xff] %vm3836_vm3, %v3815_v13  ;;  %v3814_v46 = vadd.f32 %v3695_v29, %v3420_v22  ;;  %v3423_v48 = vadd.f32 %v5134_v0, %v3029_v4  ;;  %v3705_v45 = vpop.f32.mrf.mxu0  ;;  %v7047_v4 = vld [vmem:[#allocation7_spill] sm:$0xff] }
 0x1e4   : > { %v3311_v33 = vpop.f32.mrf.mxu1  ;;  %v2644_v13 = vadd.f32 %v7048_v12, %v7047_v4  ;;  %v7067_v4 = vld [vmem:[#allocation37_spill] sm:$0xff] }
 0x1e5   : > { %3847 = vst.msk [vmem:[%s6745_s24 + $0x50] sm:$0xff] %vm3836_vm3, %v3814_v46  ;;  %v3817_v7 = vadd.f32 %v5198_v14, %v3423_v48  ;;  %v3422_v27 = vadd.f32 %v3311_v33, %v3028_v37  ;;  %v5201_v44 = vpop.f32.mrf.mxu0  ;;  %v3036_v46 = vadd.f32 %v7049_v2, %v2641_v62  ;;  %v7050_v48 = vld [vmem:[#allocation8_spill] sm:$0xff]  ;;  %v7065_v62 = vld [vmem:[#allocation13_spill] sm:$0xff] }
 0x1e6   : > { %v5137_v11 = vpop.f32.mrf.mxu1  ;;  %v7051_v14 = vld [vmem:[#allocation28_spill] sm:$0xff] }
 0x1e7   : > { %3850 = vst.msk [vmem:[%s6745_s24 + $0x68] sm:$0xff] %vm3836_vm3, %v3817_v7  ;;  %v3816_v21 = vadd.f32 %v3705_v45, %v3422_v27  ;;  %v3425_v26 = vadd.f32 %v5137_v11, %v3031_v18  ;;  %v3715_v17 = vpop.f32.mrf.mxu0  ;;  %v2643_v33 = vadd.f32 %v7051_v14, %v7050_v48  ;;  %v7052_v45 = vld [vmem:[#allocation27_spill] sm:$0xff] }
 0x1e8   : > { %v3321_v47 = vpop.f32.mrf.mxu1  ;;  %v3039_v11 = vadd.f32 %v7052_v45, %v2644_v13  ;;  %v7068_v13 = vld [vmem:[#allocation14_spill] sm:$0xff]  ;;  %v7070_v48 = vld [vmem:[#allocation39_spill] sm:$0xff] }
 0x1e9   : > { %3849 = vst.msk [vmem:[%s6745_s24 + $0x60] sm:$0xff] %vm3836_vm3, %v3816_v21  ;;  %v3819_v40 = vadd.f32 %v5201_v44, %v3425_v26  ;;  %v3424_v59 = vadd.f32 %v3321_v47, %v3030_v49  ;;  %v5204_v1 = vpop.f32.mrf.mxu0  ;;  %v7053_v49 = vld [vmem:[#allocation9_spill] sm:$0xff]  ;;  %v3038_v55 = vadd.f32 %v7055_v20, %v2643_v33  ;;  %v7071_v33 = vld [vmem:[#allocation15_spill] sm:$0xff] }
 0x1ea   : > { %v5140_v8 = vpop.f32.mrf.mxu1  ;;  %v2646_v21 = vadd.f32 %v7054_v19, %v7053_v49  ;;  %v7073_v19 = vld [vmem:[#allocation16_spill] sm:$0xff] }
 0x1eb   : > { %3852 = vst.msk [vmem:[%s6745_s24 + $0x78] sm:$0xff] %vm3836_vm3, %v3819_v40  ;;  %v3818_v35 = vadd.f32 %v3715_v17, %v3424_v59  ;;  %v3427_v39 = vadd.f32 %v5140_v8, %v3033_v54  ;;  %v3725_v63 = vpop.f32.mrf.mxu0  ;;  %v7057_v40 = vld [vmem:[#allocation32_spill] sm:$0xff] }
 0x1ec   : > { %v3331_v23 = vpop.f32.mrf.mxu1  ;;  %v2645_v59 = vadd.f32 %v7057_v40, %v7056_v36  ;;  %v3041_v34 = vadd.f32 %v7058_v6, %v2646_v21  ;;  %v2651_v21 = vadd.f32 %v6731_v53, %v7073_v19 }
 0x1ed   : > { %3851 = vst.msk [vmem:[%s6745_s24 + $0x70] sm:$0xff] %vm3836_vm3, %v3818_v35  ;;  %v3821_v30 = vadd.f32 %v5204_v1, %v3427_v39  ;;  %v3426_v43 = vadd.f32 %v3331_v23, %v3032_v56  ;;  %v5207_v16 = vpop.f32.mrf.mxu0  ;;  %v7060_v35 = vld [vmem:[#allocation34_spill] sm:$0xff] }
 0x1ee   : > { %v5143_v51 = vpop.f32.mrf.mxu1  ;;  %v2648_v39 = vadd.f32 %v7060_v35, %v7059_v42  ;;  %v3040_v10 = vadd.f32 %v7061_v15, %v2645_v59  ;;  %v7074_v59 = vld [vmem:[#allocation42_spill] sm:$0xff] }
 0x1ef   : > { %3854 = vst.msk [vmem:[%s6745_s24 + $0x88] sm:$0xff] %vm3836_vm3, %v3821_v30  ;;  %v3820_v9 = vadd.f32 %v3725_v63, %v3426_v43  ;;  %v3429_v3 = vadd.f32 %v5143_v51, %v3035_v24  ;;  %v3735_v0 = vpop.f32.mrf.mxu0  ;;  %v7063_v30 = vld [vmem:[#allocation36_spill] sm:$0xff] }
 0x1f0   : > { %v3341_v52 = vpop.f32.mrf.mxu1  ;;  %v2647_v43 = vadd.f32 %v7063_v30, %v7062_v38  ;;  %v3043_v60 = vadd.f32 %v7064_v5, %v2648_v39 }
 0x1f1   : > { %3853 = vst.msk [vmem:[%s6745_s24 + $0x80] sm:$0xff] %vm3836_vm3, %v3820_v9  ;;  %v3823_v22 = vadd.f32 %v5207_v16, %v3429_v3  ;;  %v3428_v29 = vadd.f32 %v3341_v52, %v3034_v58  ;;  %v5210_v7 = vpop.f32.mrf.mxu0  ;;  %v7066_v9 = vld [vmem:[#allocation38_spill] sm:$0xff] }
 0x1f2   : > { %v5146_v37 = vpop.f32.mrf.mxu1  ;;  %v2650_v3 = vadd.f32 %v7066_v9, %v7065_v62  ;;  %v3042_v12 = vadd.f32 %v7067_v4, %v2647_v43 }
 0x1f3   : > { %3856 = vst.msk [vmem:[%s6745_s24 + $0x98] sm:$0xff] %vm3836_vm3, %v3823_v22  ;;  %v3822_v18 = vadd.f32 %v3735_v0, %v3428_v29  ;;  %v3431_v28 = vadd.f32 %v5146_v37, %v3037_v61  ;;  %v3745_v47 = vpop.f32.mrf.mxu0  ;;  %v7069_v22 = vld [vmem:[#allocation40_spill] sm:$0xff] }
 0x1f4   : > { %v3351_v27 = vpop.f32.mrf.mxu1  ;;  %v2649_v29 = vadd.f32 %v7069_v22, %v7068_v13  ;;  %v3045_v14 = vadd.f32 %v7070_v48, %v2650_v3 }
 0x1f5   : > { %3855 = vst.msk [vmem:[%s6745_s24 + $0x90] sm:$0xff] %vm3836_vm3, %v3822_v18  ;;  %v3825_v26 = vadd.f32 %v5210_v7, %v3431_v28  ;;  %v3430_v44 = vadd.f32 %v3351_v27, %v3036_v46  ;;  %v5213_v32 = vpop.f32.mrf.mxu0  ;;  %v2652_v18 = vadd.f32 %v6726_v41, %v7071_v33 }
 0x1f6   : > { %v5149_v54 = vpop.f32.mrf.mxu1 }
 0x1f7   : > { %3858 = vst.msk [vmem:[%s6745_s24 + $0xa8] sm:$0xff] %vm3836_vm3, %v3825_v26  ;;  %v3824_v17 = vadd.f32 %v3745_v47, %v3430_v44  ;;  %v3433_v8 = vadd.f32 %v5149_v54, %v3039_v11  ;;  %v3755_v31 = vpop.f32.mrf.mxu0  ;;  %v7072_v11 = vld [vmem:[#allocation41_spill] sm:$0xff]  ;;  %v3047_v41 = vadd.f32 %v6729_v25, %v2652_v18 }
 0x1f8   : > { %v3361_v56 = vpop.f32.mrf.mxu1  ;;  %v3044_v49 = vadd.f32 %v7072_v11, %v2649_v29 }
 0x1f9   : > { %3857 = vst.msk [vmem:[%s6745_s24 + $0xa0] sm:$0xff] %vm3836_vm3, %v3824_v17  ;;  %v3827_v1 = vadd.f32 %v5213_v32, %v3433_v8  ;;  %v3432_v23 = vadd.f32 %v3361_v56, %v3038_v55  ;;  %v5216_v57 = vpop.f32.mrf.mxu0  ;;  %v3046_v17 = vadd.f32 %v7074_v59, %v2651_v21 }
 0x1fa   : > { %v5152_v24 = vpop.f32.mrf.mxu1 }
 0x1fb   : > { %3860 = vst.msk [vmem:[%s6745_s24 + $0xb8] sm:$0xff] %vm3836_vm3, %v3827_v1  ;;  %v3826_v63 = vadd.f32 %v3755_v31, %v3432_v23  ;;  %v3435_v51 = vadd.f32 %v5152_v24, %v3041_v34  ;;  %v3765_v50 = vpop.f32.mrf.mxu0 }
 0x1fc   : > { %v3371_v58 = vpop.f32.mrf.mxu1 }
 0x1fd   : > { %3859 = vst.msk [vmem:[%s6745_s24 + $0xb0] sm:$0xff] %vm3836_vm3, %v3826_v63  ;;  %v3829_v16 = vadd.f32 %v5216_v57, %v3435_v51  ;;  %v3434_v52 = vadd.f32 %v3371_v58, %v3040_v10  ;;  %v5219_v2 = vpop.f32.mrf.mxu0 }
 0x1fe   : > { %v5155_v61 = vpop.f32.mrf.mxu1 }
 0x1ff   : > { %3862 = vst.msk [vmem:[%s6745_s24 + $0xc8] sm:$0xff] %vm3836_vm3, %v3829_v16  ;;  %v3828_v0 = vadd.f32 %v3765_v50, %v3434_v52  ;;  %v3437_v37 = vadd.f32 %v5155_v61, %v3043_v60  ;;  %v3775_v27 = vpop.f32.mrf.mxu0 }
 0x200   : > { %v3381_v46 = vpop.f32.mrf.mxu1 }
 0x201   : > { %3861 = vst.msk [vmem:[%s6745_s24 + $0xc0] sm:$0xff] %vm3836_vm3, %v3828_v0  ;;  %v3831_v28 = vadd.f32 %v5219_v2, %v3437_v37  ;;  %v3436_v7 = vadd.f32 %v3381_v46, %v3042_v12  ;;  %v5222_v47 = vpop.f32.mrf.mxu0 }
 0x202   : > { %v5158_v45 = vpop.f32.mrf.mxu1 }
 0x203   : > { %3864 = vst.msk [vmem:[%s6745_s24 + $0xd8] sm:$0xff] %vm3836_vm3, %v3831_v28  ;;  %v3830_v26 = vadd.f32 %v3775_v27, %v3436_v7  ;;  %v3439_v44 = vadd.f32 %v5158_v45, %v3045_v14  ;;  %v3785_v36 = vpop.f32.mrf.mxu0 }
 0x204   : > { %v3391_v54 = vpop.f32.mrf.mxu1 }
 0x205   : > { %3863 = vst.msk [vmem:[%s6745_s24 + $0xd0] sm:$0xff] %vm3836_vm3, %v3830_v26  ;;  %v3833_v20 = vadd.f32 %v5222_v47, %v3439_v44  ;;  %v3438_v55 = vadd.f32 %v3391_v54, %v3044_v49  ;;  %v5225_v32 = vpop.f32.mrf.mxu0 }
 0x206   : > { %v5161_v40 = vpop.f32.mrf.mxu1 }
 0x207   : > { %3866 = vst.msk [vmem:[%s6745_s24 + $0xe8] sm:$0xff] %vm3836_vm3, %v3833_v20  ;;  %v3832_v53 = vadd.f32 %v3785_v36, %v3438_v55  ;;  %v3441_v8 = vadd.f32 %v5161_v40, %v3047_v41  ;;  %v3795_v34 = vpop.f32.mrf.mxu0 }
 0x208   : > { %v3401_v56 = vpop.f32.mrf.mxu1 }
 0x209   : > { %3865 = vst.msk [vmem:[%s6745_s24 + $0xe0] sm:$0xff] %vm3836_vm3, %v3832_v53  ;;  %v3835_v6 = vadd.f32 %v5225_v32, %v3441_v8  ;;  %v3440_v25 = vadd.f32 %v3401_v56, %v3046_v17 }
 0x20b   : > { %3868 = vst.msk [vmem:[%s6745_s24 + $0xf8] sm:$0xff] %vm3836_vm3, %v3835_v6  ;;  %v3834_v42 = vadd.f32 %v3795_v34, %v3440_v25 }
 0x20d   : > { %3867 = vst.msk [vmem:[%s6745_s24 + $0xf0] sm:$0xff] %vm3836_vm3, %v3834_v42 }
 0x20e PF: > { %s13_s12 = sadd.s32 1, %s5257_s12  }
 0x20f   : > { %p10_p4 = scmp.ge.s32.totalorder %s13_s12, 4  }
 0x211   :  { %12 = sbr.rel (!%p10_p4) target bundleno = 1 (0x1), region = 73 }

</bundles_post_ra>
